<compile_context>
chip_gen: v7x
topology: tpu7x:2x2x1
jax: 0.10.0
libtpu: 0.0.40
codegen_flags: <defaults>
</compile_context>

<pallas_src>
import math
import functools

import jax
import jax.numpy as jnp
from jax.experimental import pallas as pl
from jax.experimental.pallas import tpu as pltpu

LN_EPS = 1e-5                       # torch LayerNorm default
_VMEM_LIMIT = 32 * 1024 * 1024      # explicit, safe on v5e/v6e/v7x


def _gelu_tanh(x):
    # TODO(synk): tanh-approx GELU; PyTorch F.gelu default is exact erf (~1e-3 diff).
    c = math.sqrt(2.0 / math.pi)
    return 0.5 * x * (1.0 + jnp.tanh(c * (x + 0.044715 * x * x * x)))


def _layernorm(y, g, b):
    mean = jnp.mean(y, axis=-1, keepdims=True)
    yc = y - mean
    var = jnp.mean(yc * yc, axis=-1, keepdims=True)
    return yc * jax.lax.rsqrt(var + LN_EPS) * g + b


# ----------------------------------------------------------------------------
# Single fused kernel: input proj + PE -> N encoder layers -> output head.
# Grid = (batch, layer); activations live in a VMEM scratch carried across the
# (inner, "arbitrary") layer axis; per-layer weights are indexed by the layer
# grid coordinate and pipelined automatically by BlockSpec.
# ----------------------------------------------------------------------------

def _fused_forward_kernel(
        x_ref,                    # (1, t, feat)       f32
        pw_ref, pb_ref, pe_ref,   # (feat,d) bf16, (1,d) f32, (t,d) f32
        wqkv_ref, bqkv_ref,       # (1,d,3d) bf16, (1,1,3d) f32
        wo_ref, bo_ref,           # (1,d,d) bf16, (1,1,d) f32
        ln1g_ref, ln1b_ref,       # (1,1,d) f32
        w1_ref, b1_ref,           # (1,d,dff) bf16, (1,1,dff) f32
        w2_ref, b2_ref,           # (1,dff,d) bf16, (1,1,d) f32
        ln2g_ref, ln2b_ref,       # (1,1,d) f32
        ow_ref, ob_ref,           # (d,n_pad) bf16, (1,n_pad) f32
        o_ref,                    # (1, horizon, n_pad) f32
        h_scr,                    # VMEM (t, d) f32 -- carried across layers
        *, n_heads, sm_scale, horizon, num_layers):
    l = pl.program_id(1)

    # ---- first layer step only: input projection (scale folded) + pos. enc.
    @pl.when(l == 0)
    def _():
        x_in = x_ref[0]                                   # (t, feat)
        h_scr[...] = (jnp.dot(x_in.astype(jnp.bfloat16), pw_ref[...],
                              preferred_element_type=jnp.float32)
                      + pb_ref[...] + pe_ref[...])

    x = h_scr[...]                                        # (t, d) f32
    d = x.shape[-1]
    hd = d // n_heads

    # ---- self-attention block ------------------------------------------------
    qkv = jnp.dot(x.astype(jnp.bfloat16), wqkv_ref[0],
                  preferred_element_type=jnp.float32) + bqkv_ref[0]
    wo_all = wo_ref[0]                                    # (d, d) bf16

    acc = jnp.zeros_like(x)                               # out_proj accumulator
    for hi in range(n_heads):
        q = qkv[:, hi * hd:(hi + 1) * hd]
        k = qkv[:, d + hi * hd:d + (hi + 1) * hd]
        v = qkv[:, 2 * d + hi * hd:2 * d + (hi + 1) * hd]
        # scores = q @ k^T (bf16 MXU operands, f32 accumulation)
        s = jax.lax.dot_general(
            q.astype(jnp.bfloat16), k.astype(jnp.bfloat16),
            (((1,), (1,)), ((), ())),
            preferred_element_type=jnp.float32) * sm_scale
        m = jnp.max(s, axis=-1, keepdims=True)
        p = jnp.exp(s - m)
        p = p * pl.reciprocal(jnp.sum(p, axis=-1, keepdims=True), approx=True)
        ctx = jnp.dot(p.astype(jnp.bfloat16), v.astype(jnp.bfloat16),
                      preferred_element_type=jnp.float32)          # (t, hd)
        # per-head row-slice of out_proj: accumulate directly into (t, d)
        acc = acc + jnp.dot(ctx.astype(jnp.bfloat16),
                            wo_all[hi * hd:(hi + 1) * hd, :],
                            preferred_element_type=jnp.float32)

    y = _layernorm(x + acc + bo_ref[0], ln1g_ref[0], ln1b_ref[0])

    # ---- feed-forward block ---------------------------------------------------
    h1 = jnp.dot(y.astype(jnp.bfloat16), w1_ref[0],
                 preferred_element_type=jnp.float32) + b1_ref[0]
    h1 = _gelu_tanh(h1)
    h2 = jnp.dot(h1.astype(jnp.bfloat16), w2_ref[0],
                 preferred_element_type=jnp.float32) + b2_ref[0]
    z = _layernorm(y + h2, ln2g_ref[0], ln2b_ref[0])
    h_scr[...] = z

    # ---- last layer step only: LeakyReLU + output head (first `horizon` rows)
    @pl.when(l == num_layers - 1)
    def _():
        zz = z[:horizon, :]
        zz = jnp.where(zz >= 0.0, zz, 0.01 * zz)          # nn.LeakyReLU(0.01)
        o_ref[0] = (jnp.dot(zz.astype(jnp.bfloat16), ow_ref[...],
                            preferred_element_type=jnp.float32)
                    + ob_ref[...])


def transformer_forward(X, params, *, d_model, n_heads, num_nodes, horizon):
    """`Transformer.forward` (non-intervene path, Intergate = identity).

    X: (b, n, t, d_in) f32  ->  (horizon, b, num_nodes), squeezed if horizon==1.
    """
    b, n, t, d_in = X.shape
    feat = n * d_in

    # Torch: inp = X.permute(2,0,1,3).reshape(t, b, feat).  Row order inside
    # the encoder is irrelevant for per-row ops, so we use a batch-major
    # (b, t, feat) layout so per-batch attention blocks are contiguous.
    x3 = jnp.transpose(X, (0, 2, 1, 3)).reshape(b, t, feat)
    pe = params["pe"][:t]                                  # (t, d_model)

    L = params["wqkv"].shape[0]
    dff = params["w1"].shape[2]
    n_pad = params["out_w"].shape[1]
    hd = d_model // n_heads

    kern = functools.partial(_fused_forward_kernel,
                             n_heads=n_heads, sm_scale=1.0 / math.sqrt(hd),
                             horizon=horizon, num_layers=L)

    flops = b * (2 * t * feat * d_model
                 + L * (2 * t * d_model * 3 * d_model       # qkv proj
                        + 4 * n_heads * t * t * hd          # scores + context
                        + 2 * t * d_model * d_model         # out proj
                        + 4 * t * d_model * dff)            # ffn
                 + 2 * horizon * d_model * n_pad)
    transcendentals = b * L * (n_heads * t * t + t * dff)
    weight_bytes = 2 * (feat * d_model
                        + L * (4 * d_model * d_model + 2 * d_model * dff)
                        + d_model * n_pad)
    cost = pl.CostEstimate(
        flops=int(flops),
        transcendentals=int(transcendentals),
        bytes_accessed=int(b * t * feat * 4 + b * horizon * n_pad * 4
                           + b * weight_bytes))

    grid_spec = pltpu.PrefetchScalarGridSpec(
        num_scalar_prefetch=0,
        grid=(b, L),
        in_specs=[
            pl.BlockSpec((1, t, feat), lambda i, l: (i, 0, 0)),              # x
            pl.BlockSpec((feat, d_model), lambda i, l: (0, 0)),              # proj_w
            pl.BlockSpec((1, d_model), lambda i, l: (0, 0)),                 # proj_b
            pl.BlockSpec((t, d_model), lambda i, l: (0, 0)),                 # pe
            pl.BlockSpec((1, d_model, 3 * d_model), lambda i, l: (l, 0, 0)),  # wqkv
            pl.BlockSpec((1, 1, 3 * d_model), lambda i, l: (l, 0, 0)),        # bqkv
            pl.BlockSpec((1, d_model, d_model), lambda i, l: (l, 0, 0)),      # wo
            pl.BlockSpec((1, 1, d_model), lambda i, l: (l, 0, 0)),            # bo
            pl.BlockSpec((1, 1, d_model), lambda i, l: (l, 0, 0)),            # ln1_g
            pl.BlockSpec((1, 1, d_model), lambda i, l: (l, 0, 0)),            # ln1_b
            pl.BlockSpec((1, d_model, dff), lambda i, l: (l, 0, 0)),          # w1
            pl.BlockSpec((1, 1, dff), lambda i, l: (l, 0, 0)),                # b1
            pl.BlockSpec((1, dff, d_model), lambda i, l: (l, 0, 0)),          # w2
            pl.BlockSpec((1, 1, d_model), lambda i, l: (l, 0, 0)),            # b2
            pl.BlockSpec((1, 1, d_model), lambda i, l: (l, 0, 0)),            # ln2_g
            pl.BlockSpec((1, 1, d_model), lambda i, l: (l, 0, 0)),            # ln2_b
            pl.BlockSpec((d_model, n_pad), lambda i, l: (0, 0)),              # out_w
            pl.BlockSpec((1, n_pad), lambda i, l: (0, 0)),                    # out_b
        ],
        out_specs=pl.BlockSpec((1, horizon, n_pad), lambda i, l: (i, 0, 0)),
        scratch_shapes=[pltpu.VMEM((t, d_model), jnp.float32)],
    )

    out = pl.pallas_call(
        kern,
        grid_spec=grid_spec,
        out_shape=jax.ShapeDtypeStruct((b, horizon, n_pad), jnp.float32),
        compiler_params=pltpu.CompilerParams(
            dimension_semantics=("parallel", "arbitrary"),
            vmem_limit_bytes=_VMEM_LIMIT),
        cost_estimate=cost,
    )(x3, params["proj_w"], params["proj_b"], pe,
      params["wqkv"], params["bqkv"], params["wo"], params["bo"],
      params["ln1_g"], params["ln1_b"],
      params["w1"], params["b1"], params["w2"], params["b2"],
      params["ln2_g"], params["ln2_b"],
      params["out_w"], params["out_b"])

    out = out[:, :, :num_nodes]               # drop lane padding
    out = jnp.transpose(out, (1, 0, 2))       # (horizon, b, nodes)
    if horizon == 1:
        out = out[0]                          # torch .squeeze(dim=0)
    return out


# ----------------------------------------------------------------------------
# Parameters (deterministic, synthetic) + compile-time preparation folds
# ----------------------------------------------------------------------------

def fixed_positional_encoding(max_len, d_model):
    pos = jnp.arange(max_len, dtype=jnp.float32)[:, None]
    div = jnp.exp(jnp.arange(0, d_model, 2, dtype=jnp.float32)
                  * (-math.log(10000.0) / d_model))
    pe = jnp.zeros((max_len, d_model), dtype=jnp.float32)
    pe = pe.at[:, 0::2].set(jnp.sin(pos * div))
    pe = pe.at[:, 1::2].set(jnp.cos(pos * div))
    return pe


def init_params(key, *, feat_dim, d_model, n_heads, dim_feedforward,
                num_layers, num_nodes, max_len):
    def w(k, shape):
        return jax.random.normal(k, shape, dtype=jnp.float32) * 0.02

    keys = jax.random.split(key, 2 + 4 * num_layers)
    ki = iter(keys)
    params = {
        "proj_w": w(next(ki), (feat_dim, d_model)),
        "proj_b": jnp.zeros((d_model,), jnp.float32),
        "pe": fixed_positional_encoding(max_len, d_model),
        "out_w": w(next(ki), (d_model, num_nodes)),
        "out_b": jnp.zeros((num_nodes,), jnp.float32),
        "layers": [],
    }
    for _ in range(num_layers):
        params["layers"].append({
            "in_proj_w": w(next(ki), (d_model, 3 * d_model)),
            "in_proj_b": jnp.zeros((3 * d_model,), jnp.float32),
            "out_proj_w": w(next(ki), (d_model, d_model)),
            "out_proj_b": jnp.zeros((d_model,), jnp.float32),
            "lin1_w": w(next(ki), (d_model, dim_feedforward)),
            "lin1_b": jnp.zeros((dim_feedforward,), jnp.float32),
            "lin2_w": w(next(ki), (dim_feedforward, d_model)),
            "lin2_b": jnp.zeros((d_model,), jnp.float32),
            "ln1_g": jnp.ones((d_model,), jnp.float32),
            "ln1_b": jnp.zeros((d_model,), jnp.float32),
            "ln2_g": jnp.ones((d_model,), jnp.float32),
            "ln2_b": jnp.zeros((d_model,), jnp.float32),
        })
    return params


def prepare_params(raw, *, d_model, n_heads, num_nodes):
    """Compile-time folds: sqrt(d_model) into the input projection, bf16 MXU
    weights, per-layer weights stacked along a leading layer axis, and a
    lane-padded (128) output head."""
    scale = math.sqrt(d_model)
    n_pad = max(128, ((num_nodes + 127) // 128) * 128)
    layers = raw["layers"]
    L = len(layers)

    def stack(name):
        return jnp.stack([lr[name] for lr in layers])

    dff = layers[0]["lin1_w"].shape[1]
    return {
        "proj_w": (raw["proj_w"] * scale).astype(jnp.bfloat16),
        "proj_b": (raw["proj_b"] * scale).reshape(1, d_model),
        "pe": raw["pe"],
        "wqkv": stack("in_proj_w").astype(jnp.bfloat16),                 # (L,d,3d)
        "bqkv": stack("in_proj_b").reshape(L, 1, 3 * d_model),
        "wo": stack("out_proj_w").astype(jnp.bfloat16),                  # (L,d,d)
        "bo": stack("out_proj_b").reshape(L, 1, d_model),
        "ln1_g": stack("ln1_g").reshape(L, 1, d_model),
        "ln1_b": stack("ln1_b").reshape(L, 1, d_model),
        "w1": stack("lin1_w").astype(jnp.bfloat16),                      # (L,d,dff)
        "b1": stack("lin1_b").reshape(L, 1, dff),
        "w2": stack("lin2_w").astype(jnp.bfloat16),                      # (L,dff,d)
        "b2": stack("lin2_b").reshape(L, 1, d_model),
        "ln2_g": stack("ln2_g").reshape(L, 1, d_model),
        "ln2_b": stack("ln2_b").reshape(L, 1, d_model),
        "out_w": (jnp.zeros((d_model, n_pad), jnp.float32)
                  .at[:, :num_nodes].set(raw["out_w"])).astype(jnp.bfloat16),
        "out_b": jnp.zeros((1, n_pad), jnp.float32)
                 .at[0, :num_nodes].set(raw["out_b"]),
    }


# ----------------------------------------------------------------------------
# Demo
# ----------------------------------------------------------------------------

if __name__ == "__main__":
    batch = 2
    num_nodes = 4
    seq_len = 8
    input_dim = 2
    d_model = 32
    n_heads = 4
    dim_feedforward = 64
    num_layers = 2
    horizon = 1
    max_len = 16

    feat_dim = num_nodes * input_dim

    key = jax.random.PRNGKey(0)
    kx, kp = jax.random.split(key)

    X = jax.random.normal(kx, (batch, num_nodes, seq_len, input_dim),
                          dtype=jnp.float32)

    raw = init_params(kp, feat_dim=feat_dim, d_model=d_model, n_heads=n_heads,
                      dim_feedforward=dim_feedforward, num_layers=num_layers,
                      num_nodes=num_nodes, max_len=max_len)
    params = prepare_params(raw, d_model=d_model, n_heads=n_heads,
                            num_nodes=num_nodes)

    fwd = jax.jit(functools.partial(transformer_forward,
                                    d_model=d_model, n_heads=n_heads,
                                    num_nodes=num_nodes, horizon=horizon))
    out = fwd(X, params)
    jax.block_until_ready(out)

    assert out.shape == (batch, num_nodes), out.shape
    assert bool(jnp.all(jnp.isfinite(out)))
    print("KERNEL_OK")
</pallas_src>

<mosaic_0001>
module attributes {stable_mosaic.version = 11 : i64} {
  func.func @_fused_forward_kernel(%arg0: i32, %arg1: i32, %arg2: memref<1x8x8xf32, #tpu.memory_space<vmem>>, %arg3: memref<8x32xbf16, #tpu.memory_space<vmem>>, %arg4: memref<1x32xf32, #tpu.memory_space<vmem>>, %arg5: memref<8x32xf32, #tpu.memory_space<vmem>>, %arg6: memref<1x32x96xbf16, #tpu.memory_space<vmem>>, %arg7: memref<1x1x96xf32, #tpu.memory_space<vmem>>, %arg8: memref<1x32x32xbf16, #tpu.memory_space<vmem>>, %arg9: memref<1x1x32xf32, #tpu.memory_space<vmem>>, %arg10: memref<1x1x32xf32, #tpu.memory_space<vmem>>, %arg11: memref<1x1x32xf32, #tpu.memory_space<vmem>>, %arg12: memref<1x32x64xbf16, #tpu.memory_space<vmem>>, %arg13: memref<1x1x64xf32, #tpu.memory_space<vmem>>, %arg14: memref<1x64x32xbf16, #tpu.memory_space<vmem>>, %arg15: memref<1x1x32xf32, #tpu.memory_space<vmem>>, %arg16: memref<1x1x32xf32, #tpu.memory_space<vmem>>, %arg17: memref<1x1x32xf32, #tpu.memory_space<vmem>>, %arg18: memref<32x128xbf16, #tpu.memory_space<vmem>>, %arg19: memref<1x128xf32, #tpu.memory_space<vmem>>, %arg20: memref<1x1x128xf32, #tpu.memory_space<vmem>>, %arg21: memref<8x32xf32, #tpu.memory_space<vmem>>) attributes {dimension_semantics = [#tpu.dimension_semantics<parallel>, #tpu.dimension_semantics<arbitrary>], iteration_bounds = array<i64: 2, 2>, scalar_prefetch = 0 : i64, scratch_operands = 1 : i64, tpu.core_type = #tpu.core_type<tc>, window_params = [{transform_indices = @transform_0, window_bounds = array<i64: 1, 8, 8>}, {pipeline_mode = #tpu.pipeline_mode<synchronous>, transform_indices = @transform_1, window_bounds = array<i64: 8, 32>}, {pipeline_mode = #tpu.pipeline_mode<synchronous>, transform_indices = @transform_2, window_bounds = array<i64: 1, 32>}, {pipeline_mode = #tpu.pipeline_mode<synchronous>, transform_indices = @transform_3, window_bounds = array<i64: 8, 32>}, {transform_indices = @transform_4, window_bounds = array<i64: 1, 32, 96>}, {transform_indices = @transform_5, window_bounds = array<i64: 1, 1, 96>}, {transform_indices = @transform_6, window_bounds = array<i64: 1, 32, 32>}, {transform_indices = @transform_7, window_bounds = array<i64: 1, 1, 32>}, {transform_indices = @transform_8, window_bounds = array<i64: 1, 1, 32>}, {transform_indices = @transform_9, window_bounds = array<i64: 1, 1, 32>}, {transform_indices = @transform_10, window_bounds = array<i64: 1, 32, 64>}, {transform_indices = @transform_11, window_bounds = array<i64: 1, 1, 64>}, {transform_indices = @transform_12, window_bounds = array<i64: 1, 64, 32>}, {transform_indices = @transform_13, window_bounds = array<i64: 1, 1, 32>}, {transform_indices = @transform_14, window_bounds = array<i64: 1, 1, 32>}, {transform_indices = @transform_15, window_bounds = array<i64: 1, 1, 32>}, {pipeline_mode = #tpu.pipeline_mode<synchronous>, transform_indices = @transform_16, window_bounds = array<i64: 32, 128>}, {pipeline_mode = #tpu.pipeline_mode<synchronous>, transform_indices = @transform_17, window_bounds = array<i64: 1, 128>}, {transform_indices = @transform_18, window_bounds = array<i64: 1, 1, 128>}]} {
    %c0_i32 = arith.constant 0 : i32
    %0 = arith.cmpi eq, %arg1, %c0_i32 : i32
    %1 = arith.extui %0 : i1 to i32
    %c0_i32_0 = arith.constant 0 : i32
    %2 = arith.cmpi ne, %1, %c0_i32_0 : i32
    scf.if %2 {
      %c0_82 = arith.constant 0 : index
      %c0_83 = arith.constant 0 : index
      %c0_84 = arith.constant 0 : index
      %202 = vector.load %arg2[%c0_82, %c0_83, %c0_84] : memref<1x8x8xf32, #tpu.memory_space<vmem>>, vector<1x8x8xf32>
      %203 = vector.shape_cast %202 : vector<1x8x8xf32> to vector<8x8xf32>
      %204 = arith.truncf %203 : vector<8x8xf32> to vector<8x8xbf16>
      %c0_85 = arith.constant 0 : index
      %c0_86 = arith.constant 0 : index
      %205 = vector.load %arg3[%c0_85, %c0_86] : memref<8x32xbf16, #tpu.memory_space<vmem>>, vector<8x32xbf16>
      %cst_87 = arith.constant dense<0.000000e+00> : vector<8x32xf32>
      %206 = tpu.matmul %204, %205, %cst_87 {dimension_numbers = #tpu.dot_dimension_numbers<[1], [0], [0], [1], [0, 0, 1, 1], [], []>} : vector<8x8xbf16>, vector<8x32xbf16>, vector<8x32xf32> -> vector<8x32xf32>
      %c0_88 = arith.constant 0 : index
      %c0_89 = arith.constant 0 : index
      %207 = vector.load %arg4[%c0_88, %c0_89] : memref<1x32xf32, #tpu.memory_space<vmem>>, vector<1x32xf32>
      %208 = vector.broadcast %207 : vector<1x32xf32> to vector<8x32xf32>
      %209 = arith.addf %206, %208 : vector<8x32xf32>
      %c0_90 = arith.constant 0 : index
      %c0_91 = arith.constant 0 : index
      %210 = vector.load %arg5[%c0_90, %c0_91] : memref<8x32xf32, #tpu.memory_space<vmem>>, vector<8x32xf32>
      %211 = arith.addf %209, %210 : vector<8x32xf32>
      %c0_92 = arith.constant 0 : index
      %c0_93 = arith.constant 0 : index
      %212 = vector.load %arg21[%c0_92, %c0_93] : memref<8x32xf32, #tpu.memory_space<vmem>>, vector<8x32xf32>
      tpu.vector_store %arg21[%c0_92, %c0_93], %211 {strides = array<i32>} : memref<8x32xf32, #tpu.memory_space<vmem>>, vector<8x32xf32>,
    } else {
    }
    %c0 = arith.constant 0 : index
    %c0_1 = arith.constant 0 : index
    %3 = vector.load %arg21[%c0, %c0_1] : memref<8x32xf32, #tpu.memory_space<vmem>>, vector<8x32xf32>
    %4 = arith.truncf %3 : vector<8x32xf32> to vector<8x32xbf16>
    %c0_2 = arith.constant 0 : index
    %c0_3 = arith.constant 0 : index
    %c0_4 = arith.constant 0 : index
    %5 = vector.load %arg6[%c0_2, %c0_3, %c0_4] : memref<1x32x96xbf16, #tpu.memory_space<vmem>>, vector<1x32x96xbf16>
    %6 = vector.shape_cast %5 : vector<1x32x96xbf16> to vector<32x96xbf16>
    %cst = arith.constant dense<0.000000e+00> : vector<8x96xf32>
    %7 = tpu.matmul %4, %6, %cst {dimension_numbers = #tpu.dot_dimension_numbers<[1], [0], [0], [1], [0, 0, 1, 1], [], []>} : vector<8x32xbf16>, vector<32x96xbf16>, vector<8x96xf32> -> vector<8x96xf32>
    %c0_5 = arith.constant 0 : index
    %c0_6 = arith.constant 0 : index
    %c0_7 = arith.constant 0 : index
    %8 = vector.load %arg7[%c0_5, %c0_6, %c0_7] : memref<1x1x96xf32, #tpu.memory_space<vmem>>, vector<1x1x96xf32>
    %9 = vector.shape_cast %8 : vector<1x1x96xf32> to vector<1x96xf32>
    %10 = vector.broadcast %9 : vector<1x96xf32> to vector<8x96xf32>
    %11 = arith.addf %7, %10 : vector<8x96xf32>
    %c0_8 = arith.constant 0 : index
    %c0_9 = arith.constant 0 : index
    %c0_10 = arith.constant 0 : index
    %12 = vector.load %arg8[%c0_8, %c0_9, %c0_10] : memref<1x32x32xbf16, #tpu.memory_space<vmem>>, vector<1x32x32xbf16>
    %13 = vector.shape_cast %12 : vector<1x32x32xbf16> to vector<32x32xbf16>
    %cst_11 = arith.constant 0.000000e+00 : f32
    %14 = vector.broadcast %cst_11 : f32 to vector<8x32xf32>
    %15 = vector.extract_strided_slice %11 {offsets = [0, 0], sizes = [8, 8], strides = [1, 1]} : vector<8x96xf32> to vector<8x8xf32>
    %16 = vector.extract_strided_slice %11 {offsets = [0, 32], sizes = [8, 8], strides = [1, 1]} : vector<8x96xf32> to vector<8x8xf32>
    %17 = vector.extract_strided_slice %11 {offsets = [0, 64], sizes = [8, 8], strides = [1, 1]} : vector<8x96xf32> to vector<8x8xf32>
    %18 = arith.truncf %15 : vector<8x8xf32> to vector<8x8xbf16>
    %19 = arith.truncf %16 : vector<8x8xf32> to vector<8x8xbf16>
    %cst_12 = arith.constant dense<0.000000e+00> : vector<8x8xf32>
    %20 = tpu.matmul %18, %19, %cst_12 {dimension_numbers = #tpu.dot_dimension_numbers<[1], [1], [0], [0], [0, 0, 1, 0], [], []>} : vector<8x8xbf16>, vector<8x8xbf16>, vector<8x8xf32> -> vector<8x8xf32>
    %cst_13 = arith.constant 0.353553385 : f32
    %21 = vector.broadcast %cst_13 : f32 to vector<8x8xf32>
    %22 = arith.mulf %20, %21 : vector<8x8xf32>
    %cst_14 = arith.constant dense<0xFF800000> : vector<8xf32>
    %23 = vector.multi_reduction <maximumf>, %22, %cst_14 [1] : vector<8x8xf32> to vector<8xf32>
    %24 = vector.shape_cast %23 : vector<8xf32> to vector<8x1xf32>
    %25 = vector.broadcast %24 : vector<8x1xf32> to vector<8x8xf32>
    %26 = arith.subf %22, %25 : vector<8x8xf32>
    %27 = math.exp %26 : vector<8x8xf32>
    %cst_15 = arith.constant dense<0.000000e+00> : vector<8xf32>
    %28 = vector.multi_reduction <add>, %27, %cst_15 [1] : vector<8x8xf32> to vector<8xf32>
    %29 = vector.shape_cast %28 : vector<8xf32> to vector<8x1xf32>
    %30 = tpu.reciprocal %29 {approx = true} : vector<8x1xf32> -> vector<8x1xf32>
    %31 = vector.broadcast %30 : vector<8x1xf32> to vector<8x8xf32>
    %32 = arith.mulf %27, %31 : vector<8x8xf32>
    %33 = arith.truncf %32 : vector<8x8xf32> to vector<8x8xbf16>
    %34 = arith.truncf %17 : vector<8x8xf32> to vector<8x8xbf16>
    %cst_16 = arith.constant dense<0.000000e+00> : vector<8x8xf32>
    %35 = tpu.matmul %33, %34, %cst_16 {dimension_numbers = #tpu.dot_dimension_numbers<[1], [0], [0], [1], [0, 0, 1, 1], [], []>} : vector<8x8xbf16>, vector<8x8xbf16>, vector<8x8xf32> -> vector<8x8xf32>
    %36 = arith.truncf %35 : vector<8x8xf32> to vector<8x8xbf16>
    %37 = vector.extract_strided_slice %13 {offsets = [0, 0], sizes = [8, 32], strides = [1, 1]} : vector<32x32xbf16> to vector<8x32xbf16>
    %cst_17 = arith.constant dense<0.000000e+00> : vector<8x32xf32>
    %38 = tpu.matmul %36, %37, %cst_17 {dimension_numbers = #tpu.dot_dimension_numbers<[1], [0], [0], [1], [0, 0, 1, 1], [], []>} : vector<8x8xbf16>, vector<8x32xbf16>, vector<8x32xf32> -> vector<8x32xf32>
    %39 = arith.addf %14, %38 : vector<8x32xf32>
    %40 = vector.extract_strided_slice %11 {offsets = [0, 8], sizes = [8, 8], strides = [1, 1]} : vector<8x96xf32> to vector<8x8xf32>
    %41 = vector.extract_strided_slice %11 {offsets = [0, 40], sizes = [8, 8], strides = [1, 1]} : vector<8x96xf32> to vector<8x8xf32>
    %42 = vector.extract_strided_slice %11 {offsets = [0, 72], sizes = [8, 8], strides = [1, 1]} : vector<8x96xf32> to vector<8x8xf32>
    %43 = arith.truncf %40 : vector<8x8xf32> to vector<8x8xbf16>
    %44 = arith.truncf %41 : vector<8x8xf32> to vector<8x8xbf16>
    %cst_18 = arith.constant dense<0.000000e+00> : vector<8x8xf32>
    %45 = tpu.matmul %43, %44, %cst_18 {dimension_numbers = #tpu.dot_dimension_numbers<[1], [1], [0], [0], [0, 0, 1, 0], [], []>} : vector<8x8xbf16>, vector<8x8xbf16>, vector<8x8xf32> -> vector<8x8xf32>
    %cst_19 = arith.constant 0.353553385 : f32
    %46 = vector.broadcast %cst_19 : f32 to vector<8x8xf32>
    %47 = arith.mulf %45, %46 : vector<8x8xf32>
    %cst_20 = arith.constant dense<0xFF800000> : vector<8xf32>
    %48 = vector.multi_reduction <maximumf>, %47, %cst_20 [1] : vector<8x8xf32> to vector<8xf32>
    %49 = vector.shape_cast %48 : vector<8xf32> to vector<8x1xf32>
    %50 = vector.broadcast %49 : vector<8x1xf32> to vector<8x8xf32>
    %51 = arith.subf %47, %50 : vector<8x8xf32>
    %52 = math.exp %51 : vector<8x8xf32>
    %cst_21 = arith.constant dense<0.000000e+00> : vector<8xf32>
    %53 = vector.multi_reduction <add>, %52, %cst_21 [1] : vector<8x8xf32> to vector<8xf32>
    %54 = vector.shape_cast %53 : vector<8xf32> to vector<8x1xf32>
    %55 = tpu.reciprocal %54 {approx = true} : vector<8x1xf32> -> vector<8x1xf32>
    %56 = vector.broadcast %55 : vector<8x1xf32> to vector<8x8xf32>
    %57 = arith.mulf %52, %56 : vector<8x8xf32>
    %58 = arith.truncf %57 : vector<8x8xf32> to vector<8x8xbf16>
    %59 = arith.truncf %42 : vector<8x8xf32> to vector<8x8xbf16>
    %cst_22 = arith.constant dense<0.000000e+00> : vector<8x8xf32>
    %60 = tpu.matmul %58, %59, %cst_22 {dimension_numbers = #tpu.dot_dimension_numbers<[1], [0], [0], [1], [0, 0, 1, 1], [], []>} : vector<8x8xbf16>, vector<8x8xbf16>, vector<8x8xf32> -> vector<8x8xf32>
    %61 = arith.truncf %60 : vector<8x8xf32> to vector<8x8xbf16>
    %62 = vector.extract_strided_slice %13 {offsets = [8, 0], sizes = [8, 32], strides = [1, 1]} : vector<32x32xbf16> to vector<8x32xbf16>
    %cst_23 = arith.constant dense<0.000000e+00> : vector<8x32xf32>
    %63 = tpu.matmul %61, %62, %cst_23 {dimension_numbers = #tpu.dot_dimension_numbers<[1], [0], [0], [1], [0, 0, 1, 1], [], []>} : vector<8x8xbf16>, vector<8x32xbf16>, vector<8x32xf32> -> vector<8x32xf32>
    %64 = arith.addf %39, %63 : vector<8x32xf32>
    %65 = vector.extract_strided_slice %11 {offsets = [0, 16], sizes = [8, 8], strides = [1, 1]} : vector<8x96xf32> to vector<8x8xf32>
    %66 = vector.extract_strided_slice %11 {offsets = [0, 48], sizes = [8, 8], strides = [1, 1]} : vector<8x96xf32> to vector<8x8xf32>
    %67 = vector.extract_strided_slice %11 {offsets = [0, 80], sizes = [8, 8], strides = [1, 1]} : vector<8x96xf32> to vector<8x8xf32>
    %68 = arith.truncf %65 : vector<8x8xf32> to vector<8x8xbf16>
    %69 = arith.truncf %66 : vector<8x8xf32> to vector<8x8xbf16>
    %cst_24 = arith.constant dense<0.000000e+00> : vector<8x8xf32>
    %70 = tpu.matmul %68, %69, %cst_24 {dimension_numbers = #tpu.dot_dimension_numbers<[1], [1], [0], [0], [0, 0, 1, 0], [], []>} : vector<8x8xbf16>, vector<8x8xbf16>, vector<8x8xf32> -> vector<8x8xf32>
    %cst_25 = arith.constant 0.353553385 : f32
    %71 = vector.broadcast %cst_25 : f32 to vector<8x8xf32>
    %72 = arith.mulf %70, %71 : vector<8x8xf32>
    %cst_26 = arith.constant dense<0xFF800000> : vector<8xf32>
    %73 = vector.multi_reduction <maximumf>, %72, %cst_26 [1] : vector<8x8xf32> to vector<8xf32>
    %74 = vector.shape_cast %73 : vector<8xf32> to vector<8x1xf32>
    %75 = vector.broadcast %74 : vector<8x1xf32> to vector<8x8xf32>
    %76 = arith.subf %72, %75 : vector<8x8xf32>
    %77 = math.exp %76 : vector<8x8xf32>
    %cst_27 = arith.constant dense<0.000000e+00> : vector<8xf32>
    %78 = vector.multi_reduction <add>, %77, %cst_27 [1] : vector<8x8xf32> to vector<8xf32>
    %79 = vector.shape_cast %78 : vector<8xf32> to vector<8x1xf32>
    %80 = tpu.reciprocal %79 {approx = true} : vector<8x1xf32> -> vector<8x1xf32>
    %81 = vector.broadcast %80 : vector<8x1xf32> to vector<8x8xf32>
    %82 = arith.mulf %77, %81 : vector<8x8xf32>
    %83 = arith.truncf %82 : vector<8x8xf32> to vector<8x8xbf16>
    %84 = arith.truncf %67 : vector<8x8xf32> to vector<8x8xbf16>
    %cst_28 = arith.constant dense<0.000000e+00> : vector<8x8xf32>
    %85 = tpu.matmul %83, %84, %cst_28 {dimension_numbers = #tpu.dot_dimension_numbers<[1], [0], [0], [1], [0, 0, 1, 1], [], []>} : vector<8x8xbf16>, vector<8x8xbf16>, vector<8x8xf32> -> vector<8x8xf32>
    %86 = arith.truncf %85 : vector<8x8xf32> to vector<8x8xbf16>
    %87 = vector.extract_strided_slice %13 {offsets = [16, 0], sizes = [8, 32], strides = [1, 1]} : vector<32x32xbf16> to vector<8x32xbf16>
    %cst_29 = arith.constant dense<0.000000e+00> : vector<8x32xf32>
    %88 = tpu.matmul %86, %87, %cst_29 {dimension_numbers = #tpu.dot_dimension_numbers<[1], [0], [0], [1], [0, 0, 1, 1], [], []>} : vector<8x8xbf16>, vector<8x32xbf16>, vector<8x32xf32> -> vector<8x32xf32>
    %89 = arith.addf %64, %88 : vector<8x32xf32>
    %90 = vector.extract_strided_slice %11 {offsets = [0, 24], sizes = [8, 8], strides = [1, 1]} : vector<8x96xf32> to vector<8x8xf32>
    %91 = vector.extract_strided_slice %11 {offsets = [0, 56], sizes = [8, 8], strides = [1, 1]} : vector<8x96xf32> to vector<8x8xf32>
    %92 = vector.extract_strided_slice %11 {offsets = [0, 88], sizes = [8, 8], strides = [1, 1]} : vector<8x96xf32> to vector<8x8xf32>
    %93 = arith.truncf %90 : vector<8x8xf32> to vector<8x8xbf16>
    %94 = arith.truncf %91 : vector<8x8xf32> to vector<8x8xbf16>
    %cst_30 = arith.constant dense<0.000000e+00> : vector<8x8xf32>
    %95 = tpu.matmul %93, %94, %cst_30 {dimension_numbers = #tpu.dot_dimension_numbers<[1], [1], [0], [0], [0, 0, 1, 0], [], []>} : vector<8x8xbf16>, vector<8x8xbf16>, vector<8x8xf32> -> vector<8x8xf32>
    %cst_31 = arith.constant 0.353553385 : f32
    %96 = vector.broadcast %cst_31 : f32 to vector<8x8xf32>
    %97 = arith.mulf %95, %96 : vector<8x8xf32>
    %cst_32 = arith.constant dense<0xFF800000> : vector<8xf32>
    %98 = vector.multi_reduction <maximumf>, %97, %cst_32 [1] : vector<8x8xf32> to vector<8xf32>
    %99 = vector.shape_cast %98 : vector<8xf32> to vector<8x1xf32>
    %100 = vector.broadcast %99 : vector<8x1xf32> to vector<8x8xf32>
    %101 = arith.subf %97, %100 : vector<8x8xf32>
    %102 = math.exp %101 : vector<8x8xf32>
    %cst_33 = arith.constant dense<0.000000e+00> : vector<8xf32>
    %103 = vector.multi_reduction <add>, %102, %cst_33 [1] : vector<8x8xf32> to vector<8xf32>
    %104 = vector.shape_cast %103 : vector<8xf32> to vector<8x1xf32>
    %105 = tpu.reciprocal %104 {approx = true} : vector<8x1xf32> -> vector<8x1xf32>
    %106 = vector.broadcast %105 : vector<8x1xf32> to vector<8x8xf32>
    %107 = arith.mulf %102, %106 : vector<8x8xf32>
    %108 = arith.truncf %107 : vector<8x8xf32> to vector<8x8xbf16>
    %109 = arith.truncf %92 : vector<8x8xf32> to vector<8x8xbf16>
    %cst_34 = arith.constant dense<0.000000e+00> : vector<8x8xf32>
    %110 = tpu.matmul %108, %109, %cst_34 {dimension_numbers = #tpu.dot_dimension_numbers<[1], [0], [0], [1], [0, 0, 1, 1], [], []>} : vector<8x8xbf16>, vector<8x8xbf16>, vector<8x8xf32> -> vector<8x8xf32>
    %111 = arith.truncf %110 : vector<8x8xf32> to vector<8x8xbf16>
    %112 = vector.extract_strided_slice %13 {offsets = [24, 0], sizes = [8, 32], strides = [1, 1]} : vector<32x32xbf16> to vector<8x32xbf16>
    %cst_35 = arith.constant dense<0.000000e+00> : vector<8x32xf32>
    %113 = tpu.matmul %111, %112, %cst_35 {dimension_numbers = #tpu.dot_dimension_numbers<[1], [0], [0], [1], [0, 0, 1, 1], [], []>} : vector<8x8xbf16>, vector<8x32xbf16>, vector<8x32xf32> -> vector<8x32xf32>
    %114 = arith.addf %89, %113 : vector<8x32xf32>
    %115 = arith.addf %3, %114 : vector<8x32xf32>
    %c0_36 = arith.constant 0 : index
    %c0_37 = arith.constant 0 : index
    %c0_38 = arith.constant 0 : index
    %116 = vector.load %arg9[%c0_36, %c0_37, %c0_38] : memref<1x1x32xf32, #tpu.memory_space<vmem>>, vector<1x1x32xf32>
    %117 = vector.shape_cast %116 : vector<1x1x32xf32> to vector<1x32xf32>
    %118 = vector.broadcast %117 : vector<1x32xf32> to vector<8x32xf32>
    %119 = arith.addf %115, %118 : vector<8x32xf32>
    %c0_39 = arith.constant 0 : index
    %c0_40 = arith.constant 0 : index
    %c0_41 = arith.constant 0 : index
    %120 = vector.load %arg10[%c0_39, %c0_40, %c0_41] : memref<1x1x32xf32, #tpu.memory_space<vmem>>, vector<1x1x32xf32>
    %121 = vector.shape_cast %120 : vector<1x1x32xf32> to vector<1x32xf32>
    %c0_42 = arith.constant 0 : index
    %c0_43 = arith.constant 0 : index
    %c0_44 = arith.constant 0 : index
    %122 = vector.load %arg11[%c0_42, %c0_43, %c0_44] : memref<1x1x32xf32, #tpu.memory_space<vmem>>, vector<1x1x32xf32>
    %123 = vector.shape_cast %122 : vector<1x1x32xf32> to vector<1x32xf32>
    %cst_45 = arith.constant dense<0.000000e+00> : vector<8xf32>
    %124 = vector.multi_reduction <add>, %119, %cst_45 [1] : vector<8x32xf32> to vector<8xf32>
    %125 = vector.shape_cast %124 : vector<8xf32> to vector<8x1xf32>
    %cst_46 = arith.constant 3.200000e+01 : f32
    %126 = vector.broadcast %cst_46 : f32 to vector<8x1xf32>
    %127 = arith.divf %125, %126 : vector<8x1xf32>
    %128 = vector.broadcast %127 : vector<8x1xf32> to vector<8x32xf32>
    %129 = arith.subf %119, %128 : vector<8x32xf32>
    %130 = arith.mulf %129, %129 : vector<8x32xf32>
    %cst_47 = arith.constant dense<0.000000e+00> : vector<8xf32>
    %131 = vector.multi_reduction <add>, %130, %cst_47 [1] : vector<8x32xf32> to vector<8xf32>
    %132 = vector.shape_cast %131 : vector<8xf32> to vector<8x1xf32>
    %cst_48 = arith.constant 3.200000e+01 : f32
    %133 = vector.broadcast %cst_48 : f32 to vector<8x1xf32>
    %134 = arith.divf %132, %133 : vector<8x1xf32>
    %cst_49 = arith.constant 9.99999974E-6 : f32
    %135 = vector.broadcast %cst_49 : f32 to vector<8x1xf32>
    %136 = arith.addf %134, %135 : vector<8x1xf32>
    %137 = math.rsqrt %136 : vector<8x1xf32>
    %138 = vector.broadcast %137 : vector<8x1xf32> to vector<8x32xf32>
    %139 = arith.mulf %129, %138 : vector<8x32xf32>
    %140 = vector.broadcast %121 : vector<1x32xf32> to vector<8x32xf32>
    %141 = arith.mulf %139, %140 : vector<8x32xf32>
    %142 = vector.broadcast %123 : vector<1x32xf32> to vector<8x32xf32>
    %143 = arith.addf %141, %142 : vector<8x32xf32>
    %144 = arith.truncf %143 : vector<8x32xf32> to vector<8x32xbf16>
    %c0_50 = arith.constant 0 : index
    %c0_51 = arith.constant 0 : index
    %c0_52 = arith.constant 0 : index
    %145 = vector.load %arg12[%c0_50, %c0_51, %c0_52] : memref<1x32x64xbf16, #tpu.memory_space<vmem>>, vector<1x32x64xbf16>
    %146 = vector.shape_cast %145 : vector<1x32x64xbf16> to vector<32x64xbf16>
    %cst_53 = arith.constant dense<0.000000e+00> : vector<8x64xf32>
    %147 = tpu.matmul %144, %146, %cst_53 {dimension_numbers = #tpu.dot_dimension_numbers<[1], [0], [0], [1], [0, 0, 1, 1], [], []>} : vector<8x32xbf16>, vector<32x64xbf16>, vector<8x64xf32> -> vector<8x64xf32>
    %c0_54 = arith.constant 0 : index
    %c0_55 = arith.constant 0 : index
    %c0_56 = arith.constant 0 : index
    %148 = vector.load %arg13[%c0_54, %c0_55, %c0_56] : memref<1x1x64xf32, #tpu.memory_space<vmem>>, vector<1x1x64xf32>
    %149 = vector.shape_cast %148 : vector<1x1x64xf32> to vector<1x64xf32>
    %150 = vector.broadcast %149 : vector<1x64xf32> to vector<8x64xf32>
    %151 = arith.addf %147, %150 : vector<8x64xf32>
    %cst_57 = arith.constant 5.000000e-01 : f32
    %152 = vector.broadcast %cst_57 : f32 to vector<8x64xf32>
    %153 = arith.mulf %152, %151 : vector<8x64xf32>
    %cst_58 = arith.constant 4.471500e-02 : f32
    %154 = vector.broadcast %cst_58 : f32 to vector<8x64xf32>
    %155 = arith.mulf %154, %151 : vector<8x64xf32>
    %156 = arith.mulf %155, %151 : vector<8x64xf32>
    %157 = arith.mulf %156, %151 : vector<8x64xf32>
    %158 = arith.addf %151, %157 : vector<8x64xf32>
    %cst_59 = arith.constant 0.797884583 : f32
    %159 = vector.broadcast %cst_59 : f32 to vector<8x64xf32>
    %160 = arith.mulf %159, %158 : vector<8x64xf32>
    %161 = math.tanh %160 : vector<8x64xf32>
    %cst_60 = arith.constant 1.000000e+00 : f32
    %162 = vector.broadcast %cst_60 : f32 to vector<8x64xf32>
    %163 = arith.addf %162, %161 : vector<8x64xf32>
    %164 = arith.mulf %153, %163 : vector<8x64xf32>
    %165 = arith.truncf %164 : vector<8x64xf32> to vector<8x64xbf16>
    %c0_61 = arith.constant 0 : index
    %c0_62 = arith.constant 0 : index
    %c0_63 = arith.constant 0 : index
    %166 = vector.load %arg14[%c0_61, %c0_62, %c0_63] : memref<1x64x32xbf16, #tpu.memory_space<vmem>>, vector<1x64x32xbf16>
    %167 = vector.shape_cast %166 : vector<1x64x32xbf16> to vector<64x32xbf16>
    %cst_64 = arith.constant dense<0.000000e+00> : vector<8x32xf32>
    %168 = tpu.matmul %165, %167, %cst_64 {dimension_numbers = #tpu.dot_dimension_numbers<[1], [0], [0], [1], [0, 0, 1, 1], [], []>} : vector<8x64xbf16>, vector<64x32xbf16>, vector<8x32xf32> -> vector<8x32xf32>
    %c0_65 = arith.constant 0 : index
    %c0_66 = arith.constant 0 : index
    %c0_67 = arith.constant 0 : index
    %169 = vector.load %arg15[%c0_65, %c0_66, %c0_67] : memref<1x1x32xf32, #tpu.memory_space<vmem>>, vector<1x1x32xf32>
    %170 = vector.shape_cast %169 : vector<1x1x32xf32> to vector<1x32xf32>
    %171 = vector.broadcast %170 : vector<1x32xf32> to vector<8x32xf32>
    %172 = arith.addf %168, %171 : vector<8x32xf32>
    %173 = arith.addf %143, %172 : vector<8x32xf32>
    %c0_68 = arith.constant 0 : index
    %c0_69 = arith.constant 0 : index
    %c0_70 = arith.constant 0 : index
    %174 = vector.load %arg16[%c0_68, %c0_69, %c0_70] : memref<1x1x32xf32, #tpu.memory_space<vmem>>, vector<1x1x32xf32>
    %175 = vector.shape_cast %174 : vector<1x1x32xf32> to vector<1x32xf32>
    %c0_71 = arith.constant 0 : index
    %c0_72 = arith.constant 0 : index
    %c0_73 = arith.constant 0 : index
    %176 = vector.load %arg17[%c0_71, %c0_72, %c0_73] : memref<1x1x32xf32, #tpu.memory_space<vmem>>, vector<1x1x32xf32>
    %177 = vector.shape_cast %176 : vector<1x1x32xf32> to vector<1x32xf32>
    %cst_74 = arith.constant dense<0.000000e+00> : vector<8xf32>
    %178 = vector.multi_reduction <add>, %173, %cst_74 [1] : vector<8x32xf32> to vector<8xf32>
    %179 = vector.shape_cast %178 : vector<8xf32> to vector<8x1xf32>
    %cst_75 = arith.constant 3.200000e+01 : f32
    %180 = vector.broadcast %cst_75 : f32 to vector<8x1xf32>
    %181 = arith.divf %179, %180 : vector<8x1xf32>
    %182 = vector.broadcast %181 : vector<8x1xf32> to vector<8x32xf32>
    %183 = arith.subf %173, %182 : vector<8x32xf32>
    %184 = arith.mulf %183, %183 : vector<8x32xf32>
    %cst_76 = arith.constant dense<0.000000e+00> : vector<8xf32>
    %185 = vector.multi_reduction <add>, %184, %cst_76 [1] : vector<8x32xf32> to vector<8xf32>
    %186 = vector.shape_cast %185 : vector<8xf32> to vector<8x1xf32>
    %cst_77 = arith.constant 3.200000e+01 : f32
    %187 = vector.broadcast %cst_77 : f32 to vector<8x1xf32>
    %188 = arith.divf %186, %187 : vector<8x1xf32>
    %cst_78 = arith.constant 9.99999974E-6 : f32
    %189 = vector.broadcast %cst_78 : f32 to vector<8x1xf32>
    %190 = arith.addf %188, %189 : vector<8x1xf32>
    %191 = math.rsqrt %190 : vector<8x1xf32>
    %192 = vector.broadcast %191 : vector<8x1xf32> to vector<8x32xf32>
    %193 = arith.mulf %183, %192 : vector<8x32xf32>
    %194 = vector.broadcast %175 : vector<1x32xf32> to vector<8x32xf32>
    %195 = arith.mulf %193, %194 : vector<8x32xf32>
    %196 = vector.broadcast %177 : vector<1x32xf32> to vector<8x32xf32>
    %197 = arith.addf %195, %196 : vector<8x32xf32>
    %c0_79 = arith.constant 0 : index
    %c0_80 = arith.constant 0 : index
    %198 = vector.load %arg21[%c0_79, %c0_80] : memref<8x32xf32, #tpu.memory_space<vmem>>, vector<8x32xf32>
    tpu.vector_store %arg21[%c0_79, %c0_80], %197 {strides = array<i32>} : memref<8x32xf32, #tpu.memory_space<vmem>>, vector<8x32xf32>,
    %c1_i32 = arith.constant 1 : i32
    %199 = arith.cmpi eq, %arg1, %c1_i32 : i32
    %200 = arith.extui %199 : i1 to i32
    %c0_i32_81 = arith.constant 0 : i32
    %201 = arith.cmpi ne, %200, %c0_i32_81 : i32
    scf.if %201 {
      %202 = vector.extract_strided_slice %197 {offsets = [0, 0], sizes = [1, 32], strides = [1, 1]} : vector<8x32xf32> to vector<1x32xf32>
      %cst_82 = arith.constant 0.000000e+00 : f32
      %203 = vector.broadcast %cst_82 : f32 to vector<1x32xf32>
      %204 = arith.cmpf oge, %202, %203 : vector<1x32xf32>
      %cst_83 = arith.constant 0.00999999977 : f32
      %205 = vector.broadcast %cst_83 : f32 to vector<1x32xf32>
      %206 = arith.mulf %205, %202 : vector<1x32xf32>
      %207 = arith.select %204, %202, %206 : vector<1x32xi1>, vector<1x32xf32>
      %208 = arith.truncf %207 : vector<1x32xf32> to vector<1x32xbf16>
      %c0_84 = arith.constant 0 : index
      %c0_85 = arith.constant 0 : index
      %209 = vector.load %arg18[%c0_84, %c0_85] : memref<32x128xbf16, #tpu.memory_space<vmem>>, vector<32x128xbf16>
      %cst_86 = arith.constant dense<0.000000e+00> : vector<1x128xf32>
      %210 = tpu.matmul %208, %209, %cst_86 {dimension_numbers = #tpu.dot_dimension_numbers<[1], [0], [0], [1], [0, 0, 1, 1], [], []>} : vector<1x32xbf16>, vector<32x128xbf16>, vector<1x128xf32> -> vector<1x128xf32>
      %c0_87 = arith.constant 0 : index
      %c0_88 = arith.constant 0 : index
      %211 = vector.load %arg19[%c0_87, %c0_88] : memref<1x128xf32, #tpu.memory_space<vmem>>, vector<1x128xf32>
      %212 = arith.addf %210, %211 : vector<1x128xf32>
      %c0_89 = arith.constant 0 : index
      %c0_90 = arith.constant 0 : index
      %c0_91 = arith.constant 0 : index
      %213 = vector.load %arg20[%c0_89, %c0_90, %c0_91] : memref<1x1x128xf32, #tpu.memory_space<vmem>>, vector<1x1x128xf32>
      %214 = vector.shape_cast %213 : vector<1x1x128xf32> to vector<1x128xf32>
      %215 = vector.shape_cast %212 : vector<1x128xf32> to vector<1x1x128xf32>
      tpu.vector_store %arg20[%c0_89, %c0_90, %c0_91], %215 {strides = array<i32>} : memref<1x1x128xf32, #tpu.memory_space<vmem>>, vector<1x1x128xf32>,
    } else {
    }
    return
  }
  func.func @transform_0(%arg0: i32, %arg1: i32) -> (i32, i32, i32) {
    %c0_i32 = arith.constant 0 : i32
    %c0_i32_0 = arith.constant 0 : i32
    %c0_i32_1 = arith.constant 0 : i32
    return %arg0, %c0_i32, %c0_i32_0 : i32, i32, i32
  }
  func.func @transform_1(%arg0: i32, %arg1: i32) -> (i32, i32) {
    %c0_i32 = arith.constant 0 : i32
    %c0_i32_0 = arith.constant 0 : i32
    %c0_i32_1 = arith.constant 0 : i32
    return %c0_i32, %c0_i32_0 : i32, i32
  }
  func.func @transform_2(%arg0: i32, %arg1: i32) -> (i32, i32) {
    %c0_i32 = arith.constant 0 : i32
    %c0_i32_0 = arith.constant 0 : i32
    %c0_i32_1 = arith.constant 0 : i32
    return %c0_i32, %c0_i32_0 : i32, i32
  }
  func.func @transform_3(%arg0: i32, %arg1: i32) -> (i32, i32) {
    %c0_i32 = arith.constant 0 : i32
    %c0_i32_0 = arith.constant 0 : i32
    %c0_i32_1 = arith.constant 0 : i32
    return %c0_i32, %c0_i32_0 : i32, i32
  }
  func.func @transform_4(%arg0: i32, %arg1: i32) -> (i32, i32, i32) {
    %c0_i32 = arith.constant 0 : i32
    %c0_i32_0 = arith.constant 0 : i32
    %c0_i32_1 = arith.constant 0 : i32
    return %arg1, %c0_i32, %c0_i32_0 : i32, i32, i32
  }
  func.func @transform_5(%arg0: i32, %arg1: i32) -> (i32, i32, i32) {
    %c0_i32 = arith.constant 0 : i32
    %c0_i32_0 = arith.constant 0 : i32
    %c0_i32_1 = arith.constant 0 : i32
    return %arg1, %c0_i32, %c0_i32_0 : i32, i32, i32
  }
  func.func @transform_6(%arg0: i32, %arg1: i32) -> (i32, i32, i32) {
    %c0_i32 = arith.constant 0 : i32
    %c0_i32_0 = arith.constant 0 : i32
    %c0_i32_1 = arith.constant 0 : i32
    return %arg1, %c0_i32, %c0_i32_0 : i32, i32, i32
  }
  func.func @transform_7(%arg0: i32, %arg1: i32) -> (i32, i32, i32) {
    %c0_i32 = arith.constant 0 : i32
    %c0_i32_0 = arith.constant 0 : i32
    %c0_i32_1 = arith.constant 0 : i32
    return %arg1, %c0_i32, %c0_i32_0 : i32, i32, i32
  }
  func.func @transform_8(%arg0: i32, %arg1: i32) -> (i32, i32, i32) {
    %c0_i32 = arith.constant 0 : i32
    %c0_i32_0 = arith.constant 0 : i32
    %c0_i32_1 = arith.constant 0 : i32
    return %arg1, %c0_i32, %c0_i32_0 : i32, i32, i32
  }
  func.func @transform_9(%arg0: i32, %arg1: i32) -> (i32, i32, i32) {
    %c0_i32 = arith.constant 0 : i32
    %c0_i32_0 = arith.constant 0 : i32
    %c0_i32_1 = arith.constant 0 : i32
    return %arg1, %c0_i32, %c0_i32_0 : i32, i32, i32
  }
  func.func @transform_10(%arg0: i32, %arg1: i32) -> (i32, i32, i32) {
    %c0_i32 = arith.constant 0 : i32
    %c0_i32_0 = arith.constant 0 : i32
    %c0_i32_1 = arith.constant 0 : i32
    return %arg1, %c0_i32, %c0_i32_0 : i32, i32, i32
  }
  func.func @transform_11(%arg0: i32, %arg1: i32) -> (i32, i32, i32) {
    %c0_i32 = arith.constant 0 : i32
    %c0_i32_0 = arith.constant 0 : i32
    %c0_i32_1 = arith.constant 0 : i32
    return %arg1, %c0_i32, %c0_i32_0 : i32, i32, i32
  }
  func.func @transform_12(%arg0: i32, %arg1: i32) -> (i32, i32, i32) {
    %c0_i32 = arith.constant 0 : i32
    %c0_i32_0 = arith.constant 0 : i32
    %c0_i32_1 = arith.constant 0 : i32
    return %arg1, %c0_i32, %c0_i32_0 : i32, i32, i32
  }
  func.func @transform_13(%arg0: i32, %arg1: i32) -> (i32, i32, i32) {
    %c0_i32 = arith.constant 0 : i32
    %c0_i32_0 = arith.constant 0 : i32
    %c0_i32_1 = arith.constant 0 : i32
    return %arg1, %c0_i32, %c0_i32_0 : i32, i32, i32
  }
  func.func @transform_14(%arg0: i32, %arg1: i32) -> (i32, i32, i32) {
    %c0_i32 = arith.constant 0 : i32
    %c0_i32_0 = arith.constant 0 : i32
    %c0_i32_1 = arith.constant 0 : i32
    return %arg1, %c0_i32, %c0_i32_0 : i32, i32, i32
  }
  func.func @transform_15(%arg0: i32, %arg1: i32) -> (i32, i32, i32) {
    %c0_i32 = arith.constant 0 : i32
    %c0_i32_0 = arith.constant 0 : i32
    %c0_i32_1 = arith.constant 0 : i32
    return %arg1, %c0_i32, %c0_i32_0 : i32, i32, i32
  }
  func.func @transform_16(%arg0: i32, %arg1: i32) -> (i32, i32) {
    %c0_i32 = arith.constant 0 : i32
    %c0_i32_0 = arith.constant 0 : i32
    %c0_i32_1 = arith.constant 0 : i32
    return %c0_i32, %c0_i32_0 : i32, i32
  }
  func.func @transform_17(%arg0: i32, %arg1: i32) -> (i32, i32) {
    %c0_i32 = arith.constant 0 : i32
    %c0_i32_0 = arith.constant 0 : i32
    %c0_i32_1 = arith.constant 0 : i32
    return %c0_i32, %c0_i32_0 : i32, i32
  }
  func.func @transform_18(%arg0: i32, %arg1: i32) -> (i32, i32, i32) {
    %c0_i32 = arith.constant 0 : i32
    %c0_i32_0 = arith.constant 0 : i32
    %c0_i32_1 = arith.constant 0 : i32
    return %arg0, %c0_i32, %c0_i32_0 : i32, i32, i32
  }
}

</mosaic_0001>

<bundles_post_ra>
// kernel: transformer_forward.1
= control target key start
LH: loop header
LB: loop body
LE: loop exit
PB: predicated region body
PF: predicated region fallthrough
CT: control target
= control target key end

     0   :  { %s3380_s0 = inlined_call_operand.vmem [shape: f32[2,8,8], index: 0, kind: input, shape index: {}]   ;;  %s3381_s1 = inlined_call_operand.vmem [shape: bf16[8,32], index: 1, kind: input, shape index: {}]   ;;  %s3382_s2 = inlined_call_operand.vmem [shape: f32[1,32], index: 2, kind: input, shape index: {}]   ;;  %s3383_s3 = inlined_call_operand.vmem [shape: f32[8,32], index: 3, kind: input, shape index: {}]   ;;  %s3384_s4 = inlined_call_operand.vmem [shape: bf16[2,32,96], index: 4, kind: input, shape index: {}]   ;;  %s3385_s5 = inlined_call_operand.vmem [shape: f32[2,1,96], index: 5, kind: input, shape index: {}]   ;;  %s3386_s6 = inlined_call_operand.vmem [shape: bf16[2,32,32], index: 6, kind: input, shape index: {}]   ;;  %s3387_s7 = inlined_call_operand.hbm [shape: f32[2,1,32], index: 7, kind: input, shape index: {}]   ;;  %s3388_s8 = inlined_call_operand.vmem [shape: f32[2,1,32], index: 8, kind: input, shape index: {}]   ;;  %s3389_s9 = inlined_call_operand.vmem [shape: f32[2,1,32], index: 9, kind: input, shape index: {}]   ;;  %s3390_s10 = inlined_call_operand.vmem [shape: bf16[2,32,64], index: 10, kind: input, shape index: {}]   ;;  %s3391_s11 = inlined_call_operand.hbm [shape: f32[2,1,64], index: 11, kind: input, shape index: {}]   ;;  %s3392_s12 = inlined_call_operand.vmem [shape: bf16[2,64,32], index: 12, kind: input, shape index: {}]   ;;  %s3393_s13 = inlined_call_operand.hbm [shape: f32[2,1,32], index: 13, kind: input, shape index: {}]   ;;  %s3394_s14 = inlined_call_operand.vmem [shape: f32[2,1,32], index: 14, kind: input, shape index: {}]   ;;  %s3395_s15 = inlined_call_operand.vmem [shape: f32[2,1,32], index: 15, kind: input, shape index: {}]   ;;  %s3396_s16 = inlined_call_operand.vmem [shape: bf16[32,128], index: 16, kind: input, shape index: {}]   ;;  %s3397_s17 = inlined_call_operand.vmem [shape: f32[1,128], index: 17, kind: input, shape index: {}]   ;;  %s3398_s18 = inlined_call_operand.hbm [shape: f32[2,1,128], index: 18, kind: output, shape index: {}]  }
   0x1   :  { %3417 = sst [smem:[#allocation26_spill]] %s3380_s0 }
   0x2   :  { %3418 = sst [smem:[#allocation27_spill]] %s3381_s1 }
   0x3   :  { %3419 = sst [smem:[#allocation28_spill]] %s3382_s2 }
   0x4   :  { %3420 = sst [smem:[#allocation29_spill]] %s3383_s3 }
   0x5   :  { %3421 = sst [smem:[#allocation30_spill]] %s3384_s4 }
   0x6   :  { %3422 = sst [smem:[#allocation31_spill]] %s3386_s6 }
   0x7   :  { %3423 = sst [smem:[#allocation32_spill]] %s3387_s7 }
   0x8   :  { %3424 = sst [smem:[#allocation33_spill]] %s3389_s9 }
   0x9   :  { %3425 = sst [smem:[#allocation34_spill]] %s3390_s10 }
   0xa   :  { %3426 = sst [smem:[#allocation35_spill]] %s3391_s11 }
   0xb   :  { %3427 = sst [smem:[#allocation36_spill]] %s3392_s12 }
   0xc   :  { %3428 = sst [smem:[#allocation37_spill]] %s3393_s13 }
   0xd   :  { %3429 = sst [smem:[#allocation38_spill]] %s3394_s14 }
   0xe   :  { %3430 = sst [smem:[#allocation39_spill]] %s3395_s15 }
   0xf   :  { %3431 = sst [smem:[#allocation40_spill]] %s3396_s16 }
  0x10   :  { %3432 = sst [smem:[#allocation41_spill]] %s3397_s17 }
  0x11   :  { %3433 = sst [smem:[#allocation42_spill]] %s3398_s18 }
  0x12   :  { %23 = vsyncpa [#allocation4], 0 }
  0x13   :  { %25 = vsyncpa [#allocation4 + $0x1], 0 }
  0x14   :  { %26 = vsyncpa [#allocation7], 0 }
  0x15   :  { %28 = vsyncpa [#allocation7 + $0x1], 0 }
  0x16   :  { %29 = vsyncpa [#allocation5], 0 }
  0x17   :  { %31 = vsyncpa [#allocation5 + $0x1], 0  ;;  %s2846_s27 = smov 0   ;;  %s2848_s28 = smov 0  }
  0x18   :  { %s2850_s29 = smov 0   ;;  %s2852_s30 = smov 0  }
  0x19   :  { %s2854_s0 = smov 0   ;;  %s2856_s19 = smov 0  }
  0x1a   :  { %s2858_s1 = smov 0   ;;  %s2860_s20 = smov 0  }
  0x1b   :  { %s2862_s21 = smov 0   ;;  %s2864_s22 = smov 0  }
  0x1c   :  { %s2866_s2 = smov 0  }
  0x1d LB: > { %3434 = sst [smem:[#allocation13_spill]] %s2688_s27  ;;  %s2900_s23 = sadd.s32 4294967295, %s2728_s2   ;;  %s2728_s2 = sphi %s2866_s2, %s37_s2   ;;  %s2724_s22 = sphi %s2864_s22, %s3500_s22   ;;  %s2720_s21 = sphi %s2862_s21, %s3499_s21   ;;  %s2716_s20 = sphi %s2860_s20, %s3498_s20   ;;  %s2712_s1 = sphi %s2858_s1, %s3503_s1   ;;  %s2708_s19 = sphi %s2856_s19, %s3496_s19   ;;  %s2704_s0 = sphi %s2854_s0, %s3495_s0   ;;  %s2700_s30 = sphi %s2852_s30, %s3494_s30   ;;  %s2696_s29 = sphi %s2850_s29, %s3493_s29   ;;  %s2692_s28 = sphi %s2848_s28, %s3502_s28   ;;  %s2688_s27 = sphi %s2846_s27, %s3501_s27  }
  0x1e   : > { %3435 = sst [smem:[#allocation14_spill]] %s2696_s29  ;;  %s2136_s24 = sadd.s32 4294967294, %s2728_s2  }
  0x1f   : > { %3436 = sst [smem:[#allocation15_spill]] %s2704_s0  ;;  %s46_s25 = sadd.s32 1, %s2720_s21 }
  0x20   : > { %3437 = sst [smem:[#allocation16_spill]] %s2708_s19  ;;  %s49_s26 = sadd.s32 1, %s2724_s22 }
  0x21   : > { %3438 = sst [smem:[#allocation17_spill]] %s2720_s21  ;;  %p47_p0 = scmp.ge.s32.totalorder %s46_s25, 2 }
  0x22   : > { %3439 = sst [smem:[#allocation18_spill]] %s2724_s22  ;;  %s223_s18 = sadd.s32 1, %s2708_s19 }
  0x23   : > { %3440 = sst [smem:[#allocation19_spill]] %s2728_s2  ;;  %p230_p1 = scmp.ne.s32.totalorder %s2708_s19, %s2704_s0 }
  0x24   : > { %p231_p2 = scmp.eq.s32.totalorder %s2728_s2, 0  ;;  %s3505_s25 = smov (%p47_p0, %s46_s25), 0 }
  0x25   : > { %3441 = sst [smem:[#allocation20_spill]] %s3505_s25  ;;  %s3507_s26 = smov (!%p47_p0, %s49_s26), %s2724_s22 }
  0x26   : > { %s220_s17 = ssub.s32 %s2720_s21, %s3505_s25  ;;  %p2914_p3 = por %p231_p2, %p230_p1 }
  0x27   : > { %p51_p4 = scmp.ge.s32.totalorder %s3507_s26, 2  ;;  %p221_p5 = scmp.eq.s32.totalorder %s220_s17, 0 }
  0x28   : > { %p236_p6 = scmp.ne.s32.totalorder %s2704_s0, %s2700_s30  ;;  %p237_p7 = scmp.eq.s32.totalorder %s2900_s23, 0 }
  0x29   : > { %s3509_s26 = smov (%p51_p4, %s3507_s26), 0  ;;  %s499_s12 = sadd.s32 1, %s2696_s29 }
  0x2a   : > { %3443 = sst [smem:[#allocation21_spill]] %s3509_s26  ;;  %p2925_p8 = por %p237_p7, %p236_p6 }
  0x2b   : > { %s2923_s3 = scalar_select %p221_p5, %s2708_s19, %s223_s18  }
  0x2c   : > { %s3445_s25 = scalar_select %p2925_p8, 1, 0 }
  0x2d   : > { %3444 = sst [smem:[#allocation22_spill]] %s2923_s3  ;;  %s496_s15 = ssub.s32 %s2724_s22, %s3509_s26 }
  0x2e   : > { %p497_p9 = scmp.eq.s32.totalorder %s496_s15, 0  ;;  %p509_p10 = scmp.ne.s32.totalorder %s2696_s29, %s2692_s28 }
  0x2f   : > { %p510_p11 = scmp.eq.s32.totalorder %s2900_s23, 3  ;;  %p515_p13 = scmp.ne.s32.totalorder %s2692_s28, %s2688_s27 }
  0x30   : > { %s2936_s17 = scalar_select %p497_p9, %s2696_s29, %s499_s12  }
  0x31   : > { %p2938_p12 = por %p510_p11, %p509_p10  ;;  %p516_p0 = scmp.eq.s32.totalorder %s2136_s24, 3 }
  0x32   : > { %3446 = sst [smem:[#allocation23_spill]] %s2936_s17  ;;  %p2373_p1 = scmp.lt.s32.totalorder %s2728_s2, 4 }
  0x33   : > { %s3447_s30 = scalar_select %p2938_p12, 1, 0 }
  0x34   : > { %s2946_s18 = sand.u32 1, %s2708_s19   ;;  %p2948_p2 = por %p516_p0, %p515_p13 }
  0x35   : > { %3448 = sst [smem:[#allocation24_spill]] %s3447_s30  ;;  %s2953_s15 = sshll.u32 %s2720_s21, 4 }
  0x36   : > { %s3449_s26 = scalar_select %p2948_p2, 1, 0 }
  0x37   : > { %p2957_p4 = pnand %p2373_p1, %p2914_p3  ;;  %s617_s22 = sand.u32 1, %s2728_s2  }
  0x38   : > { %3450 = sst [smem:[#allocation25_spill]] %s3449_s26  ;;  %s3452_s11 = sld [smem:[#allocation35_spill]] }
  0x39   : > { %s3451_s12 = scalar_select %p2957_p4, 1, 0 }
  0x3a   : > { %s620_s17 = scalar_lea.vmem [#allocation6], %s2946_s18  ;;  %s2973_s16 = scalar_lea.sflag [#allocation7], %s617_s22 }
  0x3b   : > { %s627_s21 = sshll.u32 %s620_s17, 4  ;;  %p2979_p7 = pneg %p2957_p4  ;;  %s2970_s21 = int_to_ptr.vmem [resolvable:$true] %s627_s21 }
  0x3e   : > { %s2966_s19 = scalar_lea.hbm %s3452_s11, %s2953_s15  ;;  %s2517_s17 = scalar_lea.hbm %s3452_s11, 32 }
  0x3f   : > { %s2512_s29 = scalar_lea.hbm %s2966_s19, 16  ;;  %p2518_p11 = scmp.lt.u32.totalorder %s2966_s19, %s3452_s11 }
  0x40   : > { %p2513_p6 = scmp.ne.s32.totalorder %s2966_s19, %s2512_s29  ;;  %p2519_p13 = scmp.lt.u32.totalorder %s2517_s17, %s2512_s29 }
  0x41   : > { %p2521_p1 = scmp.lt.u32.totalorder %s2512_s29, %s2966_s19 }
  0x42   : > { %p2515_p9 = pnand %p2979_p7, %p2513_p6  ;;  %p2520_p0 = por %p2519_p13, %p2518_p11 }
  0x44   : > { %p2516_p10 = pneg %p2515_p9  ;;  %p2522_p5 = por %p2521_p1, %p2520_p0 }
  0x46   : > { %p2523_p3 = pnand %p2522_p5, %p2516_p10 }
  0x48   : > { %2526 = shalt.err (!%p2523_p3)
}
  0x49   : > { %s2527_s22 = scalar_lea.vmem %s2970_s21, 16  ;;  %s2730_s3 = smov [#allocation6]  }
  0x4a   : > { %p2528_p6 = scmp.ne.s32.totalorder %s2970_s21, %s2527_s22  ;;  %s2532_s24 = sshll.u32 %s2730_s3, 4  ;;  %s2533_s24 = int_to_ptr.vmem [resolvable:$false] %s2532_s24 }
  0x4b   : > { %s2534_s27 = scalar_lea.vmem %s2533_s24, 32  ;;  %p2535_p12 = scmp.lt.s32.totalorder %s2970_s21, %s2533_s24 }
  0x4c   : > { %p2530_p9 = pnand %p2528_p6, %p2979_p7  ;;  %p2536_p8 = scmp.lt.s32.totalorder %s2534_s27, %s2527_s22 }
  0x4e   : > { %p2531_p2 = pneg %p2530_p9  ;;  %p2537_p11 = por %p2536_p8, %p2535_p12 }
  0x50   : > { %p2538_p13 = pnand %p2537_p11, %p2531_p2 }
  0x52   : > { %2541 = shalt.err (!%p2538_p13)
}
  0x53   : > { %2365 = dma.hbm_to_vmem [thread:$0]  (!%p2957_p4), %s2966_s19, 16, %s2970_s21, %s2973_s16  }
  0x54   : > { %p3454_p5 = scmp.lt.s32.totalorder %s2728_s2, 5  ;;  %p3455_p3 = scmp.ge.s32.totalorder %s2728_s2, 1 }
  0x55   : > { %s3457_s7 = sld [smem:[#allocation32_spill]]  ;;  %s583_s3 = scalar_lea.vmem [#allocation3], %s2946_s18 }
  0x56   : > { %p3007_p10 = pnand %p3455_p3, %p3454_p5  ;;  %s590_s24 = sshll.u32 %s583_s3, 4  ;;  %s3018_s24 = int_to_ptr.vmem [resolvable:$true] %s590_s24 }
  0x57   : > { %s3458_s13 = sld [smem:[#allocation37_spill]]  ;;  %s581_s11 = scalar_lea.sflag [#allocation4], %s2946_s18 }
  0x58   : > { %s3456_s29 = scalar_select %p3007_p10, 1, 0 }
  0x5b   : > { %s3015_s22 = scalar_lea.hbm %s3457_s7, %s2953_s15  ;;  %s2547_s14 = scalar_lea.hbm %s3457_s7, 32 }
  0x5c   : > { %s2542_s2 = scalar_lea.hbm %s3015_s22, 16  ;;  %p2548_p0 = scmp.lt.u32.totalorder %s3015_s22, %s3457_s7 }
  0x5d   : > { %s3024_s27 = scalar_lea.hbm %s3458_s13, %s2953_s15  ;;  %p2543_p8 = scmp.ne.s32.totalorder %s3015_s22, %s2542_s2 }
  0x5e   : > { %p2549_p1 = scmp.lt.u32.totalorder %s2547_s14, %s2542_s2  ;;  %p2551_p9 = scmp.lt.u32.totalorder %s2542_s2, %s3015_s22 }
  0x5f   : > { %p2545_p12 = pnand %p2543_p8, %p2979_p7 }
  0x60   : > { %p2550_p6 = por %p2549_p1, %p2548_p0 }
  0x61   : > { %p2546_p2 = pneg %p2545_p12 }
  0x62   : > { %p2552_p11 = por %p2551_p9, %p2550_p6 }
  0x64   : > { %p2553_p13 = pnand %p2552_p11, %p2546_p2 }
  0x66   : > { %2556 = shalt.err (!%p2553_p13)
}
  0x67   : > { %s2557_s15 = scalar_lea.vmem %s3018_s24, 16  ;;  %s2731_s3 = smov [#allocation3]  }
  0x68   : > { %p2558_p5 = scmp.ne.s32.totalorder %s3018_s24, %s2557_s15  ;;  %s2562_s19 = sshll.u32 %s2731_s3, 4  ;;  %s2563_s19 = int_to_ptr.vmem [resolvable:$false] %s2562_s19 }
  0x69   : > { %s2564_s9 = scalar_lea.vmem %s2563_s19, 32  ;;  %p2565_p12 = scmp.lt.s32.totalorder %s3018_s24, %s2563_s19 }
  0x6a   : > { %p2560_p3 = pnand %p2558_p5, %p2979_p7  ;;  %p2566_p10 = scmp.lt.s32.totalorder %s2564_s9, %s2557_s15 }
  0x6c   : > { %p2561_p8 = pneg %p2560_p3  ;;  %p2567_p0 = por %p2566_p10, %p2565_p12 }
  0x6e   : > { %p2568_p1 = pnand %p2567_p0, %p2561_p8 }
  0x70   : > { %2571 = shalt.err (!%p2568_p1)
}
  0x71   : > { %2362 = dma.hbm_to_vmem [thread:$0]  (!%p2957_p4), %s3015_s22, 16, %s3018_s24, %s581_s11  }
  0x72   : > { %s645_s10 = scalar_lea.vmem [#allocation8], %s2946_s18  ;;  %s2572_s2 = scalar_lea.hbm %s3024_s27, 16 }
  0x73   : > { %s652_s14 = sshll.u32 %s645_s10, 4  ;;  %p2573_p2 = scmp.ne.s32.totalorder %s3024_s27, %s2572_s2  ;;  %s653_s14 = int_to_ptr.vmem [resolvable:$true] %s652_s14 }
  0x74   : > { %s2577_s17 = scalar_lea.hbm %s3458_s13, 32  ;;  %p2578_p9 = scmp.lt.u32.totalorder %s3024_s27, %s3458_s13 }
  0x75   : > { %p2575_p10 = pnand %p2573_p2, %p2979_p7  ;;  %p2579_p11 = scmp.lt.u32.totalorder %s2577_s17, %s2572_s2 }
  0x76   : > { %p2581_p5 = scmp.lt.u32.totalorder %s2572_s2, %s3024_s27 }
  0x77   : > { %p2576_p6 = pneg %p2575_p10  ;;  %p2580_p13 = por %p2579_p11, %p2578_p9 }
  0x79   : > { %p2582_p3 = por %p2581_p5, %p2580_p13 }
  0x7b   : > { %p2583_p8 = pnand %p2582_p3, %p2576_p6 }
  0x7d   : > { %2586 = shalt.err (!%p2583_p8)
}
  0x7e   : > { %s2587_s11 = scalar_lea.vmem %s653_s14, 16  ;;  %s2732_s18 = smov [#allocation8]  }
  0x7f   : > { %p2588_p12 = scmp.ne.s32.totalorder %s653_s14, %s2587_s11  ;;  %s2592_s22 = sshll.u32 %s2732_s18, 4  ;;  %s2593_s22 = int_to_ptr.vmem [resolvable:$false] %s2592_s22 }
  0x80   : > { %s2594_s24 = scalar_lea.vmem %s2593_s22, 32  ;;  %p2595_p2 = scmp.lt.s32.totalorder %s653_s14, %s2593_s22 }
  0x81   : > { %p2590_p0 = pnand %p2588_p12, %p2979_p7  ;;  %p2596_p10 = scmp.lt.s32.totalorder %s2594_s24, %s2587_s11 }
  0x83   : > { %p2591_p1 = pneg %p2590_p0  ;;  %p2597_p4 = por %p2596_p10, %p2595_p2 }
  0x85   : > { %p2598_p9 = pnand %p2597_p4, %p2591_p1 }
  0x87   : > { %2601 = shalt.err (!%p2598_p9)
}
  0x88   : > { %p3459_p11 = scmp.ne.s32.totalorder %s3451_s12, 0  ;;  %p3460_p6 = scmp.ne.s32.totalorder %s3456_s29, 0 }
  0x89   : > { %s3070_s26 = sand.u32 (!%p3460_p6), 1, %s2704_s0   ;;  %p3461_p7 = scmp.ne.s32.totalorder (!%p3460_p6), %s3445_s25, 0 }
  0x8a   : > { %2368 = dma.hbm_to_vmem [thread:$0]  (!%p3459_p11), %s3024_s27, 16, %s653_s14, %s2973_s16  }
  0x8b   : > { %673 = sbr.rel (%p3460_p6) target bundleno = 4330 (0x10ea), region = 92  ;;  %s676_s19 = scalar_lea.sflag (!%p3460_p6), [#allocation4], %s3070_s26 }
  0x92   : > { %2675 = dma.done.wait (%p3461_p7), %s676_s19, 16  }
  0x93   : > { %2677 = vsyncadd (%p3461_p7), %s676_s19, 4294967280  ;;  %s683_s12 = sand.u32 1, %s2900_s23  }
  0x94   : > { %s684_s16 = scalar_lea.sflag [#allocation7], %s683_s12 }
  0x95   : > { %2679 = dma.done.wait (%p3461_p7), %s684_s16, 32  }
  0x96   : > { %2681 = vsyncadd (%p3461_p7), %s684_s16, 4294967264  ;;  %p792_p4 = scmp.lt.s32.totalorder %s2716_s20, 1  ;;  %p796_p13 = scmp.lt.s32.totalorder %s2712_s1, 1 }
  0x97   : > { %s3462_s21 = sld [smem:[#allocation26_spill]]  ;;  %s3463_s4 = sld [smem:[#allocation30_spill]] }
  0x98   : > { %s793_s10 = scalar_select %p792_p4, %s2716_s20, 1 }
  0x99   : > { %s3089_s14 = scalar_select %p796_p13, %s2712_s1, 1 }
  0x9a   : > { %s2143_s23 = sshll.u32 %s793_s10, 3  ;;  %s3464_s6 = sld [smem:[#allocation31_spill]] }
  0x9b   : > { %s2193_s17 = sshll.u32 %s3089_s14, 4  ;;  %s3466_s27 = sld [smem:[#allocation34_spill]] }
  0x9c   : > { %s2196_s18 = sshll.u32 %s3089_s14, 5  ;;  %s3467_s7 = sld [smem:[#allocation38_spill]] }
  0x9d   : > { %s795_s30 = scalar_lea.vmem %s3462_s21, %s2143_s23  ;;  %s3098_s11 = scalar_lea.vmem %s3463_s4, %s2193_s17 }
  0x9e   : > { %s3468_s13 = sld [smem:[#allocation36_spill]]  ;;  %s3469_s25 = sld [smem:[#allocation39_spill]] }
  0x9f   : > { %s694_s2 = scalar_lea.vmem [#allocation8], %s3070_s26  ;;  %s3470_s21 = sand.u32 1, %s2692_s28  }
  0xa0   : > { %s3107_s16 = scalar_lea.vmem %s3464_s6, %s2193_s17  ;;  %s3139_s9 = scalar_lea.vmem [#allocation9], %s3470_s21 }
  0xa1   : > { %s3120_s4 = scalar_lea.vmem %s3466_s27, %s2193_s17  ;;  %p2152_p5 = scmp.ne.s32.totalorder %s2712_s1, 0 }
  0xa2   : > { %s827_s19 = scalar_lea.vmem %s3467_s7, %s3089_s14  ;;  %s3471_s24 = sld [smem:[#allocation27_spill]] (!%p2152_p5)  ;;  %vm850_vm0 = vcmask (!%p2152_p5), 1043456   ;;  %v836_v1 = vld [vmem:[%s795_s30] sm:$0xff] (!%p2152_p5)  ;;  %v2733_v2 = vmov (!%p2152_p5), 0.0   ;;  %vm2734_vm1 = vmmov (!%p2152_p5), 0   ;;  %vm846_vm2 = vcmask (!%p2152_p5), 64512  }
  0xa3   : > { %835 = sbr.rel (%p2152_p5) target bundleno = 390 (0x186), region = 108  ;;  %2237 = vmatprep.subr.bf16.mxu0 (!%p2152_p5), %v2733_v2  ;;  %2239 = vmatprep.mubr.msk.bf16.mxu0 (!%p2152_p5), %vm2734_vm1, %v2733_v2  ;;  %v837_v4 = vpack.c.bf16 (!%p2152_p5), %v836_v1, %v836_v1  ;;  %s3473_s3 = sld [smem:[#allocation29_spill]] (!%p2152_p5)  ;;  %vm896_vm3 = vcmask (!%p2152_p5), 261120  }
  0xa4   : > { %s3130_s0 = scalar_lea.vmem %s3468_s13, %s2196_s18  ;;  %s830_s23 = scalar_lea.vmem %s3469_s25, %s3089_s14 }
  0xa5   : > { %s3472_s13 = sld [smem:[#allocation28_spill]] (!%p2152_p5) }
  0xa8   : > { %v838_v0 = vld [vmem:[%s3471_s24] sm:$0xf] (!%p2152_p5) }
  0xa9   : > { %v852_v3 = vsel (!%p2152_p5), %vm850_vm0, %v838_v0, 0  ;;  %v894_v7 = vld [vmem:[%s3473_s3] sm:$0xff] (!%p2152_p5) }
  0xaa   : > { %2238 = vmatpush3.bf16.msra.mxu0 %v852_v3 }
  0xab   : > { %v2153_v5 = vld [vmem:[%s3472_s13] ss:$0 sm:$0xff] }
  0xad   : > { %2240 = vmatmul.mubr.msk.bf16.vlgmr.msra.gmra.mrb[0].mxu0 %vm846_vm2, %v837_v4 }
 0x180   : > { %v888_v6 = vpop.f32.mrb[0].mxu0 }
 0x181   : > { %v889_v8 = vadd.f32 %v2153_v5, %v888_v6  ;;  %v2241_v9 = vpop.f32.mrb[1].mxu0 }
 0x182   : > { %v891_v10 = vpop.f32.mrb[2].mxu0 }
 0x183   : > { %v895_v11 = vadd.f32 %v894_v7, %v889_v8  ;;  %v2242_v12 = vpop.f32.mrb[3].mxu0 }
 0x185   : > { %897 = vst.msk [vmem:[#allocation2] sm:$0xff] %vm896_vm3, %v895_v11 }
 0x186 PF: > { %v2480_v13 = vld [vmem:[%s3098_s11] sm:$0xff]   ;;  %v2735_v14 = vmov 0.0   ;;  %v2481_v15 = vld [vmem:[%s3098_s11 + $0x8] sm:$0xff]   ;;  %vm2736_vm4 = vmmov 0   ;;  %vm923_vm5 = vcmask 261120   ;;  %s3474_s18 = scalar_lea.vmem %s3385_s5, %s3089_s14  ;;  %s2737_s22 = smov 120  }
 0x187   : > { %2243 = vmatprep.subr.bf16.mxu1 %v2735_v14  ;;  %2257 = vmatprep.subr.bf16.mxu0 %v2735_v14  ;;  %v2155_v18 = vld [vmem:[%s3474_s18] ss:$0 sm:$0xff]  ;;  %s2738_s12 = smov 96   ;;  %s2739_s29 = smov 88   ;;  %vm975_vm6 = vcmask 64512   ;;  %vm1040_vm7 = vcmask 1043456  }
 0x188   : > { %2244 = vmatpush3.bf16.msra.mxu1 %v2480_v13  ;;  %2247 = vmatprep.mubr.msk.bf16.mxu1 %vm2736_vm4, %v2735_v14  ;;  %s2740_s10 = smov 64   ;;  %s2741_s21 = smov 56   ;;  %v967_v0 = vld [vmem:[%s3107_s16] sm:$0xf]  ;;  %v968_v2 = vld [vmem:[%s3107_s16 + $0x4] sm:$0xf] }
 0x189   : > { %2245 = vmatprep.subr.bf16.mxu1 %v2735_v14  ;;  %2259 = vmatprep.mubr.msk.bf16.mxu0 %vm2736_vm4, %v2735_v14  ;;  %s2742_s27 = smov 112   ;;  %s2743_s17 = smov 80   ;;  %v1247_v1 = vsel %vm1040_vm7, %v967_v0, 0  ;;  %v1201_v3 = vsel %vm1040_vm7, %v968_v2, 0  ;;  %vm1762_vm8 = vcmask 523264  }
 0x18a   : > { %s2744_s24 = smov 72   ;;  %s2745_s6 = smov 104  }
 0x18b   : > { %s2746_s7 = smov 48   ;;  %s2747_s13 = smov 40  }
 0x18c   : > { %v3157_v16 = vld [vmem:[#allocation2] sm:$0xff]  ;;  %2246 = vmatpush3.bf16.msra.mxu1 %v2481_v15  ;;  %s3476_s3 = scalar_lea.vmem %s3388_s8, %s3089_s14  ;;  %p2186_p3 = scmp.ne.s32.totalorder %s2712_s1, 1 }
 0x18d   : > { %v899_v17 = vpack.c.bf16 %v3157_v16, %v3157_v16  ;;  %2251 = vmatprep.subr.bf16.mxu1 %v2735_v14  ;;  %vm2749_vm9 = vmmov (!%p2186_p3), 0  }
 0x18f   : > { %2248 = vmatmul.mubr.msk.bf16.vlgmr.msra.gmra.mrb[0].mxu1 %vm923_vm5, %v899_v17 }
 0x190   : > { %2253 = vmatprep.mubr.msk.bf16.mxu1 %vm2736_vm4, %v2735_v14 }
 0x262   : > { %v961_v19 = vpop.f32.mrb[0].mxu1 }
 0x263   : > { %v962_v20 = vadd.f32 %v2155_v18, %v961_v19  ;;  %v2249_v21 = vpop.f32.mrb[1].mxu1 }
 0x264   : > { %v964_v22 = vpop.f32.mrb[2].mxu1 }
 0x265   : > { %v3173_v23 = vpack.c.bf16 %v962_v20, %v962_v20  ;;  %v2250_v24 = vpop.f32.mrb[3].mxu1 }
 0x267   : > { %1085 = vrot.lane.b32.xlu1 %v3173_v23, %s2737_s22  ;;  %973 = vrot.lane.b32.xlu0 %v3173_v23, %s2738_s12  ;;  %s3479_s22 = scalar_lea.vmem [#allocation6], %s3070_s26 }
 0x26b   : > { %1087 = vrot.lane.b32.xlu0 %v3173_v23, %s2739_s29 }
 0x2d9   : > { %v974_v25 = vpop.permute.xlu0 %973  ;;  %v1086_v29 = vpop.permute.xlu1 %1085 }
 0x2da   : > { %v980_v26 = vsel %vm975_vm6, %v974_v25, 0 }
 0x2db   : > { %2252 = vmatpush3.bf16.xpose.msra.mxu1 %v980_v26 }
 0x2dc   : > { %2263 = vmatprep.subr.bf16.mxu1 %v2735_v14 }
 0x2dd   : > { %v1088_v27 = vpop.permute.xlu0 %1087 }
 0x2de   : > { %v1093_v28 = vsel %vm975_vm6, %v1088_v27, 0 }
 0x2e2   : > { %2254 = vmatmul.mubr.msk.bf16.vlgmr.msra.gmra.mrb[4].mxu1 %vm975_vm6, %v3173_v23 }
 0x2e3   : > { %2264 = vmatpush3.bf16.xpose.msra.mxu1 %v1093_v28  ;;  %2265 = vmatprep.mubr.msk.bf16.mxu1 %vm2736_vm4, %v2735_v14 }
 0x2e4   : > { %2275 = vmatprep.subr.bf16.mxu1 %v2735_v14 }
 0x2ea   : > { %2266 = vmatmul.mubr.msk.bf16.vlgmr.msra.gmra.mrb[8].mxu1 %vm975_vm6, %v1086_v29 }
 0x2eb   : > { %2277 = vmatprep.mubr.msk.bf16.mxu1 %vm2736_vm4, %v2735_v14  ;;  %2276 = vmatpush3.bf16.msra.mxu1 %v1201_v3 }
 0x2ec   : > { %2287 = vmatprep.subr.bf16.mxu1 %v2735_v14 }
 0x3b5   : > { %v1016_v30 = vpop.f32.mrb[4].mxu1 }
 0x3b6   : > { %v1022_v31 = vmul.f32 0.35355338, %v1016_v30  ;;  %v2255_v32 = vpop.f32.mrb[5].mxu1 }
 0x3b7   : > { %v1019_v33 = vpop.f32.mrb[6].mxu1 }
 0x3b8   : > { %v2256_v34 = vpop.f32.mrb[7].mxu1  ;;  %v1023_v35 = vsel %vm975_vm6, %v1022_v31, -inf }
 0x3b9   : > { %1024 = vmax.xlane.f32.xlu1 %v1023_v35 }
 0x3bd   : > { %v1129_v36 = vpop.f32.mrb[8].mxu1 }
 0x3be   : > { %v1135_v37 = vmul.f32 0.35355338, %v1129_v36  ;;  %v2267_v38 = vpop.f32.mrb[9].mxu1 }
 0x3bf   : > { %v1132_v39 = vpop.f32.mrb[10].mxu1 }
 0x3c0   : > { %v2268_v40 = vpop.f32.mrb[11].mxu1  ;;  %v1136_v41 = vsel %vm975_vm6, %v1135_v37, -inf }
 0x3c1   : > { %1137 = vmax.xlane.f32.xlu0 %v1136_v41 }
 0x446   : > { %v1025_v42 = vpop.xlane.xlu1 %1024 }
 0x447   : > { %v1026_v43 = vsub.f32 %v1022_v31, %v1025_v42 }
 0x449   : > { %v1027_v44 = vmul.f32 1.442695, %v1026_v43 }
 0x44b   : > { %2488 = vpow2.f32 %v1027_v44 }
 0x44e   : > { %v1138_v45 = vpop.xlane.xlu0 %1137 }
 0x44f   : > { %v1139_v46 = vsub.f32 %v1135_v37, %v1138_v45 }
 0x451   : > { %v1140_v47 = vmul.f32 1.442695, %v1139_v46 }
 0x453   : > { %2490 = vpow2.f32 %v1140_v47 }
 0x455   : > { %v2489_v48 = vpop.eup %2488 }
 0x456   : > { %v1029_v49 = vsel %vm975_vm6, %v2489_v48, 0.0 }
 0x457   : > { %1030 = vadd.xlane.f32.xlu0 %v1029_v49  ;;  %v969_v49 = vld [vmem:[%s3107_s16 + $0x8] sm:$0xf] }
 0x45d   : > { %v2491_v50 = vpop.eup %2490 }
 0x45e   : > { %v1142_v51 = vsel %vm975_vm6, %v2491_v50, 0.0 }
 0x45f   : > { %1143 = vadd.xlane.f32.xlu1 %v1142_v51 }
 0x46d   : > { %1035 = vrot.lane.b32.xlu0 %v3173_v23, %s2740_s10 }
 0x470   : > { %1148 = vrot.lane.b32.xlu1 %v3173_v23, %s2741_s21 }
 0x471   : > { %1289 = vrot.lane.b32.xlu0 %v3173_v23, %s2742_s27 }
 0x474   : > { %1291 = vrot.lane.b32.xlu1 %v3173_v23, %s2743_s17  ;;  %s3482_s17 = sld [smem:[#allocation40_spill]] (!%p2186_p3) }
 0x4e4   : > { %v1031_v52 = vpop.xlane.xlu0 %1030 }
 0x4e5   : > { %2492 = vrcp.f32 %v1031_v52 }
 0x4e8   : > { %v1036_v53 = vpop.permute.xlu0 %1035 }
 0x4e9   : > { %v1042_v54 = vsel %vm1040_vm7, %v1036_v53, 0 }
 0x4ea   : > { %2258 = vmatpush3.bf16.msra.mxu0 %v1042_v54 }
 0x4eb   : > { %2269 = vmatprep.subr.bf16.mxu0 %v2735_v14 }
 0x4ec   : > { %v1144_v55 = vpop.xlane.xlu1 %1143  ;;  %v1290_v18 = vpop.permute.xlu0 %1289 }
 0x4ed   : > { %2494 = vrcp.f32 %v1144_v55 }
 0x4ef   : > { %v2493_v56 = vpop.eup %2492 }
 0x4f0   : > { %v1033_v57 = vmul.f32 %v2493_v56, %v2489_v48  ;;  %v1149_v58 = vpop.permute.xlu1 %1148 }
 0x4f1   : > { %v1154_v60 = vsel %vm1040_vm7, %v1149_v58, 0 }
 0x4f2   : > { %v1034_v59 = vpack.c.bf16 %v1033_v57, %v1033_v57 }
 0x4f4   : > { %2260 = vmatmul.mubr.msk.bf16.vlgmr.msra.gmra.mrb[0].mxu0 %vm975_vm6, %v1034_v59  ;;  %v1292_v9 = vpop.permute.xlu1 %1291 }
 0x4f5   : > { %2270 = vmatpush3.bf16.msra.mxu0 %v1154_v60  ;;  %2271 = vmatprep.mubr.msk.bf16.mxu0 %vm2736_vm4, %v2735_v14  ;;  %v1297_v15 = vsel %vm975_vm6, %v1292_v9, 0 }
 0x4f6   : > { %2281 = vmatprep.subr.bf16.mxu0 %v2735_v14 }
 0x4f7   : > { %v2495_v61 = vpop.eup %2494 }
 0x4f8   : > { %v1146_v62 = vmul.f32 %v2495_v61, %v2491_v50  ;;  %v1405_v50 = vsel %vm1040_vm7, %v969_v49, 0  ;;  %v2485_v49 = vld [vmem:[%s3130_s0 + $0x8] sm:$0xff]  }
 0x4fa   : > { %v1147_v63 = vpack.c.bf16 %v1146_v62, %v1146_v62 }
 0x4fc   : > { %2272 = vmatmul.mubr.msk.bf16.vlgmr.msra.gmra.mrb[4].mxu0 %vm975_vm6, %v1147_v63 }
 0x4fd   : > { %2283 = vmatprep.mubr.msk.bf16.mxu0 %vm2736_vm4, %v2735_v14  ;;  %2282 = vmatpush3.bf16.msra.mxu0 %v1247_v1 }
 0x4fe   : > { %2293 = vmatprep.subr.bf16.mxu0 %v2735_v14 }
 0x5c7   : > { %v1078_v4 = vpop.f32.mrb[0].mxu0 }
 0x5c8   : > { %v1084_v5 = vpack.c.bf16 %v1078_v4, %v1078_v4  ;;  %v2261_v6 = vpop.f32.mrb[1].mxu0 }
 0x5c9   : > { %v1081_v7 = vpop.f32.mrb[2].mxu0 }
 0x5ca   : > { %v2262_v8 = vpop.f32.mrb[3].mxu0  ;;  %2284 = vmatmul.mubr.msk.bf16.vlgmr.msra.gmra.mrb[8].mxu0 %vm975_vm6, %v1084_v5  ;;  %v970_v5 = vld [vmem:[%s3107_s16 + $0xc] sm:$0xf]  ;;  %s3475_s16 = scalar_lea.vmem [#allocation3], %s3070_s26 }
 0x5cb   : > { %2295 = vmatprep.mubr.msk.bf16.mxu0 %vm2736_vm4, %v2735_v14  ;;  %v1564_v6 = vsel %vm1040_vm7, %v970_v5, 0 }
 0x5cf   : > { %v1190_v10 = vpop.f32.mrb[4].mxu0 }
 0x5d0   : > { %v1196_v11 = vpack.c.bf16 %v1190_v10, %v1190_v10  ;;  %v2273_v12 = vpop.f32.mrb[5].mxu0 }
 0x5d1   : > { %v1193_v13 = vpop.f32.mrb[6].mxu0 }
 0x5d2   : > { %v2274_v17 = vpop.f32.mrb[7].mxu0  ;;  %2278 = vmatmul.mubr.msk.bf16.vlgmr.msra.gmra.mrb[12].mxu1 %vm975_vm6, %v1196_v11 }
 0x5d3   : > { %2288 = vmatpush3.bf16.xpose.msra.mxu1 %v1297_v15  ;;  %2289 = vmatprep.mubr.msk.bf16.mxu1 %vm2736_vm4, %v2735_v14 }
 0x5d4   : > { %2299 = vmatprep.subr.bf16.mxu1 %v2735_v14 }
 0x5da   : > { %2290 = vmatmul.mubr.msk.bf16.vlgmr.msra.gmra.mrb[16].mxu1 %vm975_vm6, %v1290_v18 }
 0x5db   : > { %2301 = vmatprep.mubr.msk.bf16.mxu1 %vm2736_vm4, %v2735_v14  ;;  %2300 = vmatpush3.bf16.msra.mxu1 %v1405_v50  ;;  %v2486_v50 = vld [vmem:[%s3130_s0 + $0x10] sm:$0xff]  }
 0x5dc   : > { %2311 = vmatprep.subr.bf16.mxu1 %v2735_v14 }
 0x69d   : > { %v1283_v19 = vpop.f32.mrb[8].mxu0 }
 0x69e   : > { %v2285_v20 = vpop.f32.mrb[9].mxu0 }
 0x69f   : > { %v1286_v21 = vpop.f32.mrb[10].mxu0 }
 0x6a0   : > { %v2286_v22 = vpop.f32.mrb[11].mxu0 }
 0x6a5   : > { %v1237_v24 = vpop.f32.mrb[12].mxu1 }
 0x6a6   : > { %v3224_v25 = vadd.f32 %v1283_v19, %v1237_v24  ;;  %v2279_v26 = vpop.f32.mrb[13].mxu1 }
 0x6a7   : > { %v1240_v27 = vpop.f32.mrb[14].mxu1 }
 0x6a8   : > { %v2280_v28 = vpop.f32.mrb[15].mxu1  ;;  %v2171_v27 = vld [vmem:[%s3475_s16] ss:$0 sm:$0xff] }
 0x6ad   : > { %v1333_v29 = vpop.f32.mrb[16].mxu1 }
 0x6ae   : > { %v1339_v30 = vmul.f32 0.35355338, %v1333_v29  ;;  %v2291_v31 = vpop.f32.mrb[17].mxu1 }
 0x6af   : > { %v1336_v32 = vpop.f32.mrb[18].mxu1 }
 0x6b0   : > { %v2292_v33 = vpop.f32.mrb[19].mxu1  ;;  %v1340_v34 = vsel %vm975_vm6, %v1339_v30, -inf }
 0x6b1   : > { %1341 = vmax.xlane.f32.xlu1 %v1340_v34 }
 0x6c2   : > { %1450 = vrot.lane.b32.xlu1 %v3173_v23, %s2744_s24 }
 0x6c6   : > { %1448 = vrot.lane.b32.xlu1 %v3173_v23, %s2745_s6 }
 0x73e   : > { %v1342_v35 = vpop.xlane.xlu1 %1341 }
 0x73f   : > { %v1343_v36 = vsub.f32 %v1339_v30, %v1342_v35 }
 0x741   : > { %v1344_v37 = vmul.f32 1.442695, %v1343_v36 }
 0x742   : > { %v1451_v45 = vpop.permute.xlu1 %1450 }
 0x743   : > { %2496 = vpow2.f32 %v1344_v37  ;;  %v1456_v47 = vsel %vm975_vm6, %v1451_v45, 0  ;;  %v2482_v37 = vld [vmem:[%s3120_s4] sm:$0xff]  }
 0x746   : > { %v1449_v48 = vpop.permute.xlu1 %1448 }
 0x74d   : > { %v2497_v38 = vpop.eup %2496 }
 0x74e   : > { %v1346_v39 = vsel %vm975_vm6, %v2497_v38, 0.0 }
 0x74f   : > { %1347 = vadd.xlane.f32.xlu0 %v1346_v39 }
 0x765   : > { %1352 = vrot.lane.b32.xlu0 %v3173_v23, %s2746_s7 }
 0x7dc   : > { %v1348_v40 = vpop.xlane.xlu0 %1347 }
 0x7dd   : > { %2498 = vrcp.f32 %v1348_v40 }
 0x7e0   : > { %v1353_v41 = vpop.permute.xlu0 %1352 }
 0x7e1   : > { %v1358_v42 = vsel %vm1040_vm7, %v1353_v41, 0 }
 0x7e2   : > { %2294 = vmatpush3.bf16.msra.mxu0 %v1358_v42  ;;  %v2172_v42 = vld [vmem:[%s3476_s3] ss:$0 sm:$0xff] }
 0x7e3   : > { %2305 = vmatprep.subr.bf16.mxu0 %v2735_v14 }
 0x7e7   : > { %v2499_v43 = vpop.eup %2498 }
 0x7e8   : > { %v1350_v44 = vmul.f32 %v2499_v43, %v2497_v38  ;;  %v2483_v38 = vld [vmem:[%s3120_s4 + $0x8] sm:$0xff]   ;;  %s3477_s4 = sld [smem:[#allocation33_spill]] }
 0x7ea   : > { %v1351_v46 = vpack.c.bf16 %v1350_v44, %v1350_v44 }
 0x7ec   : > { %2296 = vmatmul.mubr.msk.bf16.vlgmr.msra.gmra.mrb[12].mxu0 %vm975_vm6, %v1351_v46 }
 0x7ed   : > { %2306 = vmatpush3.bf16.xpose.msra.mxu0 %v1456_v47  ;;  %2307 = vmatprep.mubr.msk.bf16.mxu0 %vm2736_vm4, %v2735_v14 }
 0x7ee   : > { %2317 = vmatprep.subr.bf16.mxu0 %v2735_v14  ;;  %s3478_s18 = scalar_lea.vmem %s3477_s4, %s3089_s14 }
 0x7ef   : > { %v2173_v44 = vld [vmem:[%s3478_s18] ss:$0 sm:$0xff] }
 0x7f4   : > { %2308 = vmatmul.mubr.msk.bf16.vlgmr.msra.gmra.mrb[16].mxu0 %vm975_vm6, %v1449_v48  ;;  %v2484_v48 = vld [vmem:[%s3130_s0] sm:$0xff]  }
 0x7f5   : > { %2319 = vmatprep.mubr.msk.bf16.mxu0 %vm2736_vm4, %v2735_v14  ;;  %2318 = vmatpush3.bf16.msra.mxu0 %v1564_v6 }
 0x7f6   : > { %2331 = vmatprep.subr.bf16.mxu0 %v2735_v14 }
 0x8bf   : > { %v1394_v51 = vpop.f32.mrb[12].mxu0 }
 0x8c0   : > { %v1400_v52 = vpack.c.bf16 %v1394_v51, %v1394_v51  ;;  %v2297_v53 = vpop.f32.mrb[13].mxu0  ;;  %v2487_v51 = vld [vmem:[%s3130_s0 + $0x18] sm:$0xff]  }
 0x8c1   : > { %v1397_v54 = vpop.f32.mrb[14].mxu0 }
 0x8c2   : > { %v2298_v55 = vpop.f32.mrb[15].mxu0  ;;  %2302 = vmatmul.mubr.msk.bf16.vlgmr.msra.gmra.mrb[20].mxu1 %vm975_vm6, %v1400_v52  ;;  %v2174_v52 = vld [vmem:[%s3479_s22] ss:$0 sm:$0xff] }
 0x8c3   : > { %2313 = vmatprep.mubr.msk.bf16.mxu1 %vm2736_vm4, %v2735_v14 }
 0x8c7   : > { %v1492_v56 = vpop.f32.mrb[16].mxu0 }
 0x8c8   : > { %v1498_v57 = vmul.f32 0.35355338, %v1492_v56  ;;  %v2309_v58 = vpop.f32.mrb[17].mxu0 }
 0x8c9   : > { %v1495_v59 = vpop.f32.mrb[18].mxu0 }
 0x8ca   : > { %v2310_v60 = vpop.f32.mrb[19].mxu0  ;;  %v1499_v61 = vsel %vm975_vm6, %v1498_v57, -inf }
 0x8cb   : > { %1500 = vmax.xlane.f32.xlu0 %v1499_v61 }
 0x8e1   : > { %1511 = vrot.lane.b32.xlu0 %v3173_v23, %s2747_s13 }
 0x958   : > { %v1501_v62 = vpop.xlane.xlu0 %1500 }
 0x959   : > { %v1502_v63 = vsub.f32 %v1498_v57, %v1501_v62 }
 0x95b   : > { %v1503_v0 = vmul.f32 1.442695, %v1502_v63 }
 0x95c   : > { %v1512_v1 = vpop.permute.xlu0 %1511 }
 0x95d   : > { %2500 = vpow2.f32 %v1503_v0  ;;  %v1517_v2 = vsel %vm1040_vm7, %v1512_v1, 0 }
 0x95e   : > { %2312 = vmatpush3.bf16.msra.mxu1 %v1517_v2 }
 0x95f   : > { %2323 = vmatprep.subr.bf16.mxu1 %v2735_v14 }
 0x967   : > { %v2501_v3 = vpop.eup %2500 }
 0x968   : > { %v1505_v4 = vsel %vm975_vm6, %v2501_v3, 0.0 }
 0x969   : > { %1506 = vadd.xlane.f32.xlu1 %v1505_v4 }
 0x995   : > { %v1441_v23 = vpop.f32.mrb[20].mxu1 }
 0x996   : > { %v1447_v7 = vadd.f32 %v1441_v23, %v3224_v25  ;;  %v2303_v8 = vpop.f32.mrb[21].mxu1 }
 0x997   : > { %v1444_v9 = vpop.f32.mrb[22].mxu1 }
 0x998   : > { %v2304_v10 = vpop.f32.mrb[23].mxu1 }
 0x9f6   : > { %v1507_v11 = vpop.xlane.xlu1 %1506 }
 0x9f7   : > { %2502 = vrcp.f32 %v1507_v11 }
 0xa01   : > { %v2503_v12 = vpop.eup %2502 }
 0xa02   : > { %v1509_v13 = vmul.f32 %v2503_v12, %v2501_v3  ;;  %v2178_v3 = vld [vmem:[%s694_s2] ss:$0 sm:$0xff] }
 0xa04   : > { %v1510_v15 = vpack.c.bf16 %v1509_v13, %v1509_v13 }
 0xa06   : > { %2314 = vmatmul.mubr.msk.bf16.vlgmr.msra.gmra.mrb[24].mxu1 %vm975_vm6, %v1510_v15 }
 0xa07   : > { %2327 = vmatprep.mubr.msk.bf16.mxu1 %vm2736_vm4, %v2735_v14  ;;  %2324 = vmatpush3.bf16.msra.mxu1 %v2482_v37 }
 0xa08   : > { %2325 = vmatprep.subr.bf16.mxu1 %v2735_v14 }
 0xa0b   : > { %2326 = vmatpush3.bf16.msra.mxu1 %v2483_v38 }
 0xad9   : > { %v1553_v17 = vpop.f32.mrb[24].mxu1 }
 0xada   : > { %v1559_v18 = vpack.c.bf16 %v1553_v17, %v1553_v17  ;;  %v2315_v19 = vpop.f32.mrb[25].mxu1 }
 0xadb   : > { %v1556_v20 = vpop.f32.mrb[26].mxu1 }
 0xadc   : > { %v2316_v21 = vpop.f32.mrb[27].mxu1  ;;  %2320 = vmatmul.mubr.msk.bf16.vlgmr.msra.gmra.mrb[20].mxu0 %vm975_vm6, %v1559_v18 }
 0xadd   : > { %2339 = vmatprep.mubr.msk.bf16.mxu0 %vm2736_vm4, %v2735_v14  ;;  %2332 = vmatpush3.bf16.msra.mxu0 %v2484_v48  ;;  %v2184_v21 = vld [vmem:[%s827_s19] ss:$0 sm:$0xff] }
 0xade   : > { %2333 = vmatprep.subr.bf16.mxu0 %v2735_v14 }
 0xae1   : > { %2334 = vmatpush3.bf16.msra.mxu0 %v2485_v49 }
 0xae2   : > { %2335 = vmatprep.subr.bf16.mxu0 %v2735_v14 }
 0xae5   : > { %2336 = vmatpush3.bf16.msra.mxu0 %v2486_v50 }
 0xae6   : > { %2337 = vmatprep.subr.bf16.mxu0 %v2735_v14 }
 0xae9   : > { %2338 = vmatpush3.bf16.msra.mxu0 %v2487_v51 }
 0xbaf   : > { %v1600_v22 = vpop.f32.mrb[20].mxu0 }
 0xbb0   : > { %v1606_v24 = vadd.f32 %v1600_v22, %v1447_v7  ;;  %v2321_v25 = vpop.f32.mrb[21].mxu0 }
 0xbb1   : > { %v1603_v26 = vpop.f32.mrb[22].mxu0 }
 0xbb2   : > { %v1607_v28 = vadd.f32 %v1606_v24, %v3157_v16  ;;  %v2322_v29 = vpop.f32.mrb[23].mxu0  ;;  %v2185_v24 = vld [vmem:[%s830_s23] ss:$0 sm:$0xff]  ;;  %s3483_s23 = sld [smem:[#allocation41_spill]] (!%p2186_p3) }
 0xbb3   : > { %v2511_v29 = vld [vmem:[%s3482_s17 + $0x8] sm:$0xff] (!%p2186_p3)  }
 0xbb4   : > { %v1615_v30 = vadd.f32 %v2171_v27, %v1607_v28  ;;  %v2510_v27 = vld [vmem:[%s3482_s17] sm:$0xff] (!%p2186_p3)   ;;  %v2748_v28 = vmov (!%p2186_p3), 0.0  }
 0xbb5   : > { %2343 = vmatprep.subr.bf16.mxu0 (!%p2186_p3), %v2748_v28 }
 0xbb6   : > { %v1618_v31 = vsel %vm923_vm5, %v1615_v30, 0.0 }
 0xbb7   : > { %1619 = vadd.xlane.f32.xlu1 %v1618_v31 }
 0xc44   : > { %v1620_v32 = vpop.xlane.xlu1 %1619 }
 0xc45   : > { %v1622_v33 = vmul.f32 0.03125, %v1620_v32 }
 0xc47   : > { %v1623_v34 = vsub.f32 %v1615_v30, %v1622_v33  ;;  %v1849_v33 = vld [vmem:[%s3483_s23] sm:$0x1] (!%p2186_p3) }
 0xc49   : > { %v1624_v35 = vmul.f32 %v1623_v34, %v1623_v34 }
 0xc4b   : > { %v1625_v36 = vsel %vm923_vm5, %v1624_v35, 0.0 }
 0xc4c   : > { %1626 = vadd.xlane.f32.xlu1 %v1625_v36 }
 0xcd9   : > { %v1627_v16 = vpop.xlane.xlu1 %1626 }
 0xcda   : > { %v1628_v39 = vmul.f32 0.03125, %v1627_v16 }
 0xcdc   : > { %v1629_v40 = vadd.f32 1e-05, %v1628_v39 }
 0xcde   : > { %2504 = vrsqrt.f32 %v1629_v40 }
 0xce8   : > { %v2505_v41 = vpop.eup %2504 }
 0xce9   : > { %v1631_v43 = vmul.f32 %v2505_v41, %v1623_v34 }
 0xceb   : > { %v1638_v45 = vmul.f32 %v2172_v42, %v1631_v43 }
 0xced   : > { %v1645_v46 = vadd.f32 %v2173_v44, %v1638_v45 }
 0xcef   : > { %v1646_v47 = vpack.c.bf16 %v1645_v46, %v1645_v46 }
 0xcf1   : > { %2328 = vmatmul.mubr.msk.bf16.vlgmr.msra.gmra.mrb[28].mxu1 %vm923_vm5, %v1646_v47 }
 0xdc4   : > { %v1707_v53 = vpop.f32.mrb[28].mxu1 }
 0xdc5   : > { %v1708_v54 = vadd.f32 %v2174_v52, %v1707_v53  ;;  %v2329_v55 = vpop.f32.mrb[29].mxu1 }
 0xdc6   : > { %v1710_v56 = vpop.f32.mrb[30].mxu1 }
 0xdc7   : > { %v1714_v57 = vmul.f32 0.044715, %v1708_v54  ;;  %v2330_v58 = vpop.f32.mrb[31].mxu1  ;;  %v1713_v0 = vmul.f32 0.5, %v1708_v54 }
 0xdc9   : > { %v1715_v59 = vmul.f32 %v1714_v57, %v1708_v54 }
 0xdcb   : > { %v1716_v60 = vmul.f32 %v1715_v59, %v1708_v54 }
 0xdcd   : > { %v1717_v61 = vadd.f32 %v1716_v60, %v1708_v54 }
 0xdcf   : > { %v1718_v62 = vmul.f32 0.7978846, %v1717_v61 }
 0xdd1   : > { %2506 = vtanh.f32 %v1718_v62 }
 0xddb   : > { %v2507_v63 = vpop.eup %2506 }
 0xddc   : > { %v1720_v1 = vadd.f32 1.0, %v2507_v63 }
 0xdde   : > { %v1721_v2 = vmul.f32 %v1720_v1, %v1713_v0 }
 0xde0   : > { %v1722_v14 = vpack.c.bf16 %v1721_v2, %v1721_v2 }
 0xde2   : > { %2340 = vmatmul.mubr.msk.bf16.vlgmr.msra.gmra.mrb[24].mxu0 %vm1762_vm8, %v1722_v14 }
 0xde3   : > { %2344 = vmatpush3.bf16.msra.mxu0 (!%p2186_p3), %v2510_v27  ;;  %2347 = vmatprep.mubr.msk.bf16.mxu0 (!%p2186_p3), %vm2749_vm9, %v2748_v28 }
 0xde4   : > { %2345 = vmatprep.subr.bf16.mxu0 (!%p2186_p3), %v2748_v28 }
 0xde7   : > { %2346 = vmatpush3.bf16.msra.mxu0 (!%p2186_p3), %v2511_v29 }
 0xeb5   : > { %v1800_v4 = vpop.f32.mrb[24].mxu0 }
 0xeb6   : > { %v1801_v5 = vadd.f32 %v2178_v3, %v1800_v4  ;;  %v2341_v6 = vpop.f32.mrb[25].mxu0 }
 0xeb7   : > { %v1803_v23 = vpop.f32.mrb[26].mxu0 }
 0xeb8   : > { %v2342_v7 = vpop.f32.mrb[27].mxu0  ;;  %v1806_v8 = vadd.f32 %v1801_v5, %v1645_v46 }
 0xeba   : > { %v1809_v9 = vsel %vm923_vm5, %v1806_v8, 0.0 }
 0xebb   : > { %1810 = vadd.xlane.f32.xlu1 %v1809_v9 }
 0xf48   : > { %v1811_v10 = vpop.xlane.xlu1 %1810 }
 0xf49   : > { %v1812_v11 = vmul.f32 0.03125, %v1811_v10 }
 0xf4b   : > { %v1813_v12 = vsub.f32 %v1806_v8, %v1812_v11 }
 0xf4d   : > { %v1814_v13 = vmul.f32 %v1813_v12, %v1813_v12 }
 0xf4f   : > { %v1815_v15 = vsel %vm923_vm5, %v1814_v13, 0.0 }
 0xf50   : > { %1816 = vadd.xlane.f32.xlu1 %v1815_v15 }
 0xfdd   : > { %v1817_v17 = vpop.xlane.xlu1 %1816 }
 0xfde   : > { %v1818_v18 = vmul.f32 0.03125, %v1817_v17 }
 0xfe0   : > { %v1819_v19 = vadd.f32 1e-05, %v1818_v18 }
 0xfe2   : > { %2508 = vrsqrt.f32 %v1819_v19 }
 0xfec   : > { %v2509_v20 = vpop.eup %2508 }
 0xfed   : > { %v1821_v22 = vmul.f32 %v2509_v20, %v1813_v12  ;;  %1840 = sbr.rel (%p2186_p3) target bundleno = 4303 (0x10cf), region = 112 }
 0xfef   : > { %v1828_v25 = vmul.f32 %v2184_v21, %v1821_v22 }
 0xff1   : > { %v1835_v26 = vadd.f32 %v2185_v24, %v1828_v25 }
 0xff3   : > { %1836 = vst.msk [vmem:[#allocation2] sm:$0xff] %vm923_vm5, %v1835_v26  ;;  %vm1841_vm10 = vcmp.ge.f32.partialorder (!%p2186_p3), %v1835_v26, 0.0  ;;  %v1842_v30 = vmul.f32 (!%p2186_p3), 0.01, %v1835_v26 }
 0xff5   : > { %v1843_v31 = vsel %vm1841_vm10, %v1835_v26, %v1842_v30 }
 0xff6   : > { %v1844_v32 = vpack.c.bf16 %v1843_v31, %v1843_v31 }
 0xff8   : > { %2348 = vmatmul.mubr.msk.bf16.vlgmr.msra.gmra.mrb[0].mxu0 %vm923_vm5, %v1844_v32 }
0x10cb   : > { %v1899_v34 = vpop.f32.mrb[0].mxu0 }
0x10cc   : > { %v1900_v35 = vadd.f32 %v1899_v34, %v1849_v33  ;;  %v2349_v36 = vpop.f32.mrb[1].mxu0 }
0x10cd   : > { %v1902_v37 = vpop.f32.mrb[2].mxu0 }
0x10ce   : > { %1905 = vst [vmem:[%s3139_s9] sm:$0x1] %v1900_v35  ;;  %v2350_v38 = vpop.f32.mrb[3].mxu0 }
0x10cf PF: > { %s3484_s6 = sld [smem:[#allocation24_spill]]  ;;  %s2190_s7 = sshll.u32 %s2716_s20, 4 }
0x10d0   : > { %s3485_s25 = sld [smem:[#allocation42_spill]]  ;;  %s1919_s3 = sshll.u32 %s3139_s9, 4  ;;  %s1920_s3 = int_to_ptr.vmem [resolvable:$true] %s1919_s3 }
0x10d1   : > { %s3486_s30 = sand.u32 1, %s2692_s28   ;;  %s2602_s4 = scalar_lea.vmem %s1920_s3, 16 }
0x10d2   : > { %s1907_s11 = scalar_lea.sflag [#allocation5], %s3486_s30  ;;  %p2603_p8 = scmp.ne.s32.totalorder %s1920_s3, %s2602_s4 }
0x10d3   : > { %s2750_s18 = smov [#allocation9]  }
0x10d4   : > { %s2606_s22 = sshll.u32 %s2750_s18, 4  ;;  %s2607_s22 = int_to_ptr.vmem [resolvable:$false] %s2606_s22 }
0x10d5   : > { %p3487_p12 = scmp.ne.s32.totalorder %s3484_s6, 0  ;;  %s2608_s0 = scalar_lea.vmem %s2607_s22, 32 }
0x10d6   : > { %s3321_s15 = scalar_lea.hbm %s3485_s25, %s2190_s7  ;;  %p2609_p2 = scmp.lt.s32.totalorder %s1920_s3, %s2607_s22 }
0x10d7   : > { %p2604_p0 = pnand %p2603_p8, %p3487_p12  ;;  %p2610_p10 = scmp.lt.s32.totalorder %s2608_s0, %s2602_s4 }
0x10d9   : > { %p2605_p1 = pneg %p2604_p0  ;;  %p2611_p9 = por %p2610_p10, %p2609_p2 }
0x10db   : > { %p2612_p11 = pnand %p2611_p9, %p2605_p1 }
0x10dd   : > { %2615 = shalt.err (!%p2612_p11)
}
0x10de   : > { %s2616_s20 = scalar_lea.hbm %s3321_s15, 16  ;;  %s2620_s2 = scalar_lea.hbm %s3485_s25, 32 }
0x10df   : > { %p2617_p6 = scmp.ne.s32.totalorder %s3321_s15, %s2616_s20  ;;  %p2621_p13 = scmp.lt.u32.totalorder %s3321_s15, %s3485_s25 }
0x10e0   : > { %p2622_p5 = scmp.lt.u32.totalorder %s2620_s2, %s2616_s20  ;;  %p2624_p8 = scmp.lt.u32.totalorder %s2616_s20, %s3321_s15 }
0x10e1   : > { %p2618_p7 = pnand %p2617_p6, %p3487_p12 }
0x10e2   : > { %p2623_p3 = por %p2622_p5, %p2621_p13 }
0x10e3   : > { %p2619_p4 = pneg %p2618_p7 }
0x10e4   : > { %p2625_p0 = por %p2624_p8, %p2623_p3 }
0x10e6   : > { %p2626_p1 = pnand %p2625_p0, %p2619_p4 }
0x10e8   : > { %2629 = shalt.err (!%p2626_p1)
}
0x10e9   : > { %2357 = dma.vmem_to_hbm [thread:$0]  (%p3487_p12), %s1920_s3, 16, %s3321_s15, %s1907_s11  }
0x10ea PF: > { %s3488_s10 = sld [smem:[#allocation19_spill]]  ;;  %s3489_s21 = sld [smem:[#allocation13_spill]] }
0x10eb   : > { %s3490_s27 = sld [smem:[#allocation25_spill]] }
0x10f0   : > { %p2374_p2 = scmp.ge.s32.totalorder %s3488_s10, 2  ;;  %s1931_s19 = sand.u32 1, %s3489_s21  }
0x10f1   : > { %p3491_p10 = scmp.ne.s32.totalorder %s3490_s27, 0  ;;  %s1932_s24 = scalar_lea.sflag [#allocation5], %s1931_s19 }
0x10f3   : > { %p2370_p9 = pnand %p2374_p2, %p3491_p10 }
0x10f5   : > { %2683 = dma.done.wait (!%p2370_p9), %s1932_s24, 16  }
0x10f6   : > { %2685 = vsyncadd (!%p2370_p9), %s1932_s24, 4294967280  ;;  %s37_s2 = sadd.s32 1, %s3488_s10   ;;  %s3492_s1 = sld [smem:[#allocation14_spill]] }
0x10f7   : > { %p34_p11 = scmp.ge.s32.totalorder %s37_s2, 6   ;;  %s3493_s29 = sld [smem:[#allocation23_spill]] }
0x10f8   : > { %s3494_s30 = sld [smem:[#allocation15_spill]]  ;;  %s3495_s0 = sld [smem:[#allocation16_spill]] }
0x10f9   : > { %s3496_s19 = sld [smem:[#allocation22_spill]]  ;;  %s3497_s14 = sld [smem:[#allocation17_spill]] }
0x10fa   : > { %s3498_s20 = sld [smem:[#allocation18_spill]]  ;;  %s3499_s21 = sld [smem:[#allocation20_spill]] }
0x10fb   : > { %s3500_s22 = sld [smem:[#allocation21_spill]]  ;;  %s3501_s27 = smov %s2692_s28 }
0x10fc   : > { %s3502_s28 = smov %s3492_s1  ;;  %36 = sbr.rel (!%p34_p11) target bundleno = 29 (0x1d), region = 199 }
0x10ff   : > { %s3503_s1 = smov %s3497_s14 }
0x1103   :  { %1936 = vsyncpa [#allocation4], 1 }
0x1104   :  { %1938 = vsyncpa [#allocation4 + $0x1], 1 }
0x1105   :  { %1939 = vsyncpa [#allocation7], 1 }
0x1106   :  { %1941 = vsyncpa [#allocation7 + $0x1], 1 }
0x1107   :  { %1942 = vsyncpa [#allocation5], 1 }
0x1108   :  { %1944 = vsyncpa [#allocation5 + $0x1], 1 }

</bundles_post_ra>
